<compile_context>
chip_gen: v5e
topology: v5e:2x2
jax: 0.10.0
libtpu: 0.0.40
codegen_flags: <defaults>
</compile_context>

<pallas_src>
import functools

import jax
import jax.numpy as jnp
from jax.experimental import pallas as pl
from jax.experimental.pallas import tpu as pltpu

LANE = 128          # TPU vreg lane width
_NEG_BIG = -1e30    # fills padded class lanes -> exp() underflows to 0


def _round_up(n, m):
    return ((n + m - 1) // m) * m


def _mlp_logsoftmax_kernel(x_ref, w1_ref, b1_ref, w2_ref, b2_ref,
                           w3_ref, b3_ref, out_ref, *, mxu_dtype, n_cls):
    """One batch tile: 3 matmuls + bias/ReLU + log_softmax + packed store."""
    x = x_ref[...]                                    # (tb, f_in)  f32

    # fc1 + relu.  K = f_in (30) is handled by the MXU directly; no lane pad.
    h1 = jnp.dot(x.astype(mxu_dtype), w1_ref[...],
                 preferred_element_type=jnp.float32)
    h1 = jnp.maximum(h1 + b1_ref[...], 0.0)

    # fc2 + relu
    h2 = jnp.dot(h1.astype(mxu_dtype), w2_ref[...],
                 preferred_element_type=jnp.float32)
    h2 = jnp.maximum(h2 + b2_ref[...], 0.0)

    # fc3
    logits = jnp.dot(h2.astype(mxu_dtype), w3_ref[...],
                     preferred_element_type=jnp.float32)
    logits = logits + b3_ref[...]                     # (tb, cp)

    # log_softmax over the (padded) class axis: padded lanes carry a -1e30
    # bias so they never win the max and contribute exp(-huge)=0 to the sum.
    m = jnp.max(logits, axis=-1, keepdims=True)
    shifted = logits - m
    lse = jnp.log(jnp.sum(jnp.exp(shifted), axis=-1, keepdims=True))
    logp = shifted - lse                              # (tb, cp) f32

    # Pack the output: transpose to (cp, tb) and keep only the n_cls valid
    # rows.  The store is lane-dense (tb lanes, multiple of 128, unmasked)
    # and writes only the useful bytes.  The XLU transpose rides in the
    # otherwise-idle xlane slot of this memory-bound kernel.
    out_ref[...] = jnp.transpose(logp)[:n_cls, :].astype(out_ref.dtype)


def _choose_batch_tile(B, batch_tile):
    """Lane-aligned batch tile with >=4 grid steps when the batch allows it."""
    tb = max(LANE, (min(batch_tile, _round_up(B, LANE)) // LANE) * LANE)
    # >=4 steps keeps the pipeline busy and guarantees both v7x TensorCores
    # get tiles under dimension_semantics=("parallel",).
    while tb > LANE and -(-B // tb) < 4:
        tb = max(LANE, ((tb // 2) // LANE) * LANE)
    return tb


def cell_classifier_forward(x, params, *, batch_tile=2048,
                            use_bf16_matmul=True, out_dtype=jnp.float32):
    """x: (B, input_size) float32; params: dict with w1,b1,w2,b2,w3,b3.

    Weights are stored transposed vs. torch: w_l has shape
    (in_features, out_features), so the kernel computes x @ W + b.
    Returns log_softmax logits of shape (B, num_classes), `out_dtype`.
    """
    w1, b1 = params["w1"], params["b1"]
    w2, b2 = params["w2"], params["b2"]
    w3, b3 = params["w3"], params["b3"]

    B, f_in = x.shape
    hidden = w1.shape[1]
    n_cls = w3.shape[1]

    hp = _round_up(hidden, LANE)      # hidden padded to 128 lanes (exact: 0-pad)
    cp = _round_up(n_cls, LANE)       # class lanes padded to 128

    def pad2(a, rows, cols, fill=0.0):
        a = a.reshape((-1, a.shape[-1])) if a.ndim == 2 else a.reshape(1, -1)
        return jnp.pad(a, ((0, rows - a.shape[0]), (0, cols - a.shape[1])),
                       constant_values=fill)

    # Lane-dense parameters (tiny, VMEM-resident).  Zero padding keeps the
    # math exact: padded hidden units are ReLU(0)=0 and feed zero weight rows.
    w1p = pad2(w1, f_in, hp)          # (f_in, hp)  -- note: rows NOT padded
    w2p = pad2(w2, hp, hp)
    w3p = pad2(w3, hp, cp)
    b1p = pad2(b1, 1, hp)
    b2p = pad2(b2, 1, hp)
    # Padded class lanes get a huge negative bias so log_softmax ignores them.
    b3p = jnp.pad(b3.reshape(1, -1), ((0, 0), (0, cp - n_cls)),
                  constant_values=_NEG_BIG)

    mxu_dtype = jnp.bfloat16 if use_bf16_matmul else jnp.float32
    if use_bf16_matmul:
        w1p = w1p.astype(jnp.bfloat16)
        w2p = w2p.astype(jnp.bfloat16)
        w3p = w3p.astype(jnp.bfloat16)

    tb = _choose_batch_tile(B, batch_tile)
    b_pad = _round_up(B, tb)
    # Only the batch axis is (possibly) padded; the feature axis stays logical.
    xp = x if b_pad == B else jnp.pad(x, ((0, b_pad - B), (0, 0)))

    grid = (b_pad // tb,)

    def run(single_buffer_weights):
        res_kwargs = ({"pipeline_mode": pl.Buffered(1)}
                      if single_buffer_weights else {})

        def resident(arr):
            # Same block every grid step -> stays VMEM-resident across tiles.
            return pl.BlockSpec(arr.shape, lambda i: (0, 0), **res_kwargs)

        call = pl.pallas_call(
            functools.partial(_mlp_logsoftmax_kernel,
                              mxu_dtype=mxu_dtype, n_cls=n_cls),
            out_shape=jax.ShapeDtypeStruct((n_cls, b_pad), out_dtype),
            grid=grid,
            in_specs=[
                pl.BlockSpec((tb, f_in), lambda i: (i, 0)),  # x tile (pipelined)
                resident(w1p), resident(b1p),
                resident(w2p), resident(b2p),
                resident(w3p), resident(b3p),
            ],
            # Packed / transposed output: (n_cls, tb) block, tb lanes -> dense.
            out_specs=pl.BlockSpec((n_cls, tb), lambda i: (0, i)),
            compiler_params=pltpu.CompilerParams(
                dimension_semantics=("parallel",),   # v7x: split tiles over 2 TCs
            ),
        )
        return call(xp, w1p, b1p, w2p, b2p, w3p, b3p)

    try:
        out_t = run(True)
    except Exception:
        # pipeline_mode=pl.Buffered(1) not supported by this Pallas build:
        # fall back to default double buffering (costs ~200 KiB VMEM, harmless).
        out_t = run(False)

    # (n_cls, b_pad) -> (B, n_cls): transpose/slice over useful bytes only.
    return out_t.T[:B, :]


def init_params(key, input_size, hidden_size, num_classes):
    """Deterministic synthetic init (uniform, torch Linear default style)."""
    ks = jax.random.split(key, 6)

    def lin(kw, kb, fan_in, fan_out):
        bound = 1.0 / jnp.sqrt(fan_in)
        w = jax.random.uniform(kw, (fan_in, fan_out), jnp.float32, -bound, bound)
        b = jax.random.uniform(kb, (1, fan_out), jnp.float32, -bound, bound)
        return w, b

    w1, b1 = lin(ks[0], ks[1], input_size, hidden_size)
    w2, b2 = lin(ks[2], ks[3], hidden_size, hidden_size)
    w3, b3 = lin(ks[4], ks[5], hidden_size, num_classes)
    return {"w1": w1, "b1": b1, "w2": w2, "b2": b2, "w3": w3, "b3": b3}


if __name__ == "__main__":
    input_size = 30    # per the module
    hidden_size = 50   # per the module
    num_classes = 8    # synthetic stand-in for len(unique CELL_TYPE)
    batch = 300        # not a tile multiple -> exercises batch pad + 3-step grid

    key = jax.random.PRNGKey(0)
    k_x, k_p = jax.random.split(key)
    x = jax.random.normal(k_x, (batch, input_size), jnp.float32)
    params = init_params(k_p, input_size, hidden_size, num_classes)

    # reference in plain JAX
    def ref(x, p):
        h = jnp.maximum(x @ p["w1"] + p["b1"], 0.0)
        h = jnp.maximum(h @ p["w2"] + p["b2"], 0.0)
        logits = h @ p["w3"] + p["b3"]
        return jax.nn.log_softmax(logits, axis=1)

    r = ref(x, params)

    # f32 MXU path: exact forward semantics (tight tolerance).
    out_f32 = jax.block_until_ready(
        cell_classifier_forward(x, params, use_bf16_matmul=False))
    assert out_f32.shape == (batch, num_classes)
    assert jnp.allclose(out_f32, r, atol=1e-5, rtol=1e-5), float(
        jnp.max(jnp.abs(out_f32 - r)))

    # Default path: bf16 MXU operands, f32 bias/ReLU/log_softmax (recommended
    # on v5e/v6e/v7x); only perturbs logits at ~1e-2 level.
    out = jax.block_until_ready(cell_classifier_forward(x, params))
    assert out.shape == (batch, num_classes)
    assert bool(jnp.all(jnp.isfinite(out)))
    assert jnp.allclose(out, r, atol=1e-1, rtol=1e-1)

    print("KERNEL_OK")
</pallas_src>

<mosaic_0001>
module attributes {stable_mosaic.version = 11 : i64} {
  func.func @_mlp_logsoftmax_kernel(%arg0: i32, %arg1: memref<128x30xf32, #tpu.memory_space<vmem>>, %arg2: memref<30x128xf32, #tpu.memory_space<vmem>>, %arg3: memref<1x128xf32, #tpu.memory_space<vmem>>, %arg4: memref<128x128xf32, #tpu.memory_space<vmem>>, %arg5: memref<1x128xf32, #tpu.memory_space<vmem>>, %arg6: memref<128x128xf32, #tpu.memory_space<vmem>>, %arg7: memref<1x128xf32, #tpu.memory_space<vmem>>, %arg8: memref<8x128xf32, #tpu.memory_space<vmem>>) attributes {dimension_semantics = [#tpu.dimension_semantics<parallel>], iteration_bounds = array<i64: 3>, scalar_prefetch = 0 : i64, scratch_operands = 0 : i64, tpu.core_type = #tpu.core_type<tc>, window_params = [{transform_indices = @transform_0, window_bounds = array<i64: 128, 30>}, {pipeline_mode = #tpu.pipeline_mode<synchronous>, transform_indices = @transform_1, window_bounds = array<i64: 30, 128>}, {pipeline_mode = #tpu.pipeline_mode<synchronous>, transform_indices = @transform_2, window_bounds = array<i64: 1, 128>}, {pipeline_mode = #tpu.pipeline_mode<synchronous>, transform_indices = @transform_3, window_bounds = array<i64: 128, 128>}, {pipeline_mode = #tpu.pipeline_mode<synchronous>, transform_indices = @transform_4, window_bounds = array<i64: 1, 128>}, {pipeline_mode = #tpu.pipeline_mode<synchronous>, transform_indices = @transform_5, window_bounds = array<i64: 128, 128>}, {pipeline_mode = #tpu.pipeline_mode<synchronous>, transform_indices = @transform_6, window_bounds = array<i64: 1, 128>}, {transform_indices = @transform_7, window_bounds = array<i64: 8, 128>}]} {
    %c0 = arith.constant 0 : index
    %c0_0 = arith.constant 0 : index
    %0 = vector.load %arg1[%c0, %c0_0] : memref<128x30xf32, #tpu.memory_space<vmem>>, vector<128x30xf32>
    %c0_1 = arith.constant 0 : index
    %c0_2 = arith.constant 0 : index
    %1 = vector.load %arg2[%c0_1, %c0_2] : memref<30x128xf32, #tpu.memory_space<vmem>>, vector<30x128xf32>
    %cst = arith.constant dense<0.000000e+00> : vector<128x128xf32>
    %2 = tpu.matmul %0, %1, %cst {dimension_numbers = #tpu.dot_dimension_numbers<[1], [0], [0], [1], [0, 0, 1, 1], [], []>} : vector<128x30xf32>, vector<30x128xf32>, vector<128x128xf32> -> vector<128x128xf32>
    %c0_3 = arith.constant 0 : index
    %c0_4 = arith.constant 0 : index
    %3 = vector.load %arg3[%c0_3, %c0_4] : memref<1x128xf32, #tpu.memory_space<vmem>>, vector<1x128xf32>
    %4 = vector.broadcast %3 : vector<1x128xf32> to vector<128x128xf32>
    %5 = arith.addf %2, %4 : vector<128x128xf32>
    %cst_5 = arith.constant 0.000000e+00 : f32
    %6 = vector.broadcast %cst_5 : f32 to vector<128x128xf32>
    %7 = arith.maximumf %5, %6 : vector<128x128xf32>
    %c0_6 = arith.constant 0 : index
    %c0_7 = arith.constant 0 : index
    %8 = vector.load %arg4[%c0_6, %c0_7] : memref<128x128xf32, #tpu.memory_space<vmem>>, vector<128x128xf32>
    %cst_8 = arith.constant dense<0.000000e+00> : vector<128x128xf32>
    %9 = tpu.matmul %7, %8, %cst_8 {dimension_numbers = #tpu.dot_dimension_numbers<[1], [0], [0], [1], [0, 0, 1, 1], [], []>} : vector<128x128xf32>, vector<128x128xf32>, vector<128x128xf32> -> vector<128x128xf32>
    %c0_9 = arith.constant 0 : index
    %c0_10 = arith.constant 0 : index
    %10 = vector.load %arg5[%c0_9, %c0_10] : memref<1x128xf32, #tpu.memory_space<vmem>>, vector<1x128xf32>
    %11 = vector.broadcast %10 : vector<1x128xf32> to vector<128x128xf32>
    %12 = arith.addf %9, %11 : vector<128x128xf32>
    %cst_11 = arith.constant 0.000000e+00 : f32
    %13 = vector.broadcast %cst_11 : f32 to vector<128x128xf32>
    %14 = arith.maximumf %12, %13 : vector<128x128xf32>
    %c0_12 = arith.constant 0 : index
    %c0_13 = arith.constant 0 : index
    %15 = vector.load %arg6[%c0_12, %c0_13] : memref<128x128xf32, #tpu.memory_space<vmem>>, vector<128x128xf32>
    %cst_14 = arith.constant dense<0.000000e+00> : vector<128x128xf32>
    %16 = tpu.matmul %14, %15, %cst_14 {dimension_numbers = #tpu.dot_dimension_numbers<[1], [0], [0], [1], [0, 0, 1, 1], [], []>} : vector<128x128xf32>, vector<128x128xf32>, vector<128x128xf32> -> vector<128x128xf32>
    %c0_15 = arith.constant 0 : index
    %c0_16 = arith.constant 0 : index
    %17 = vector.load %arg7[%c0_15, %c0_16] : memref<1x128xf32, #tpu.memory_space<vmem>>, vector<1x128xf32>
    %18 = vector.broadcast %17 : vector<1x128xf32> to vector<128x128xf32>
    %19 = arith.addf %16, %18 : vector<128x128xf32>
    %cst_17 = arith.constant dense<0xFF800000> : vector<128xf32>
    %20 = vector.multi_reduction <maximumf>, %19, %cst_17 [1] : vector<128x128xf32> to vector<128xf32>
    %21 = vector.shape_cast %20 : vector<128xf32> to vector<128x1xf32>
    %22 = vector.broadcast %21 : vector<128x1xf32> to vector<128x128xf32>
    %23 = arith.subf %19, %22 : vector<128x128xf32>
    %24 = math.exp %23 : vector<128x128xf32>
    %cst_18 = arith.constant dense<0.000000e+00> : vector<128xf32>
    %25 = vector.multi_reduction <add>, %24, %cst_18 [1] : vector<128x128xf32> to vector<128xf32>
    %26 = vector.shape_cast %25 : vector<128xf32> to vector<128x1xf32>
    %27 = math.log %26 : vector<128x1xf32>
    %28 = vector.broadcast %27 : vector<128x1xf32> to vector<128x128xf32>
    %29 = arith.subf %23, %28 : vector<128x128xf32>
    %30 = tpu.transpose %29, [1, 0] : vector<128x128xf32> -> vector<128x128xf32>
    %31 = vector.extract_strided_slice %30 {offsets = [0, 0], sizes = [8, 128], strides = [1, 1]} : vector<128x128xf32> to vector<8x128xf32>
    %c0_19 = arith.constant 0 : index
    %c0_20 = arith.constant 0 : index
    %32 = vector.load %arg8[%c0_19, %c0_20] : memref<8x128xf32, #tpu.memory_space<vmem>>, vector<8x128xf32>
    tpu.vector_store %arg8[%c0_19, %c0_20], %31 {strides = array<i32>} : memref<8x128xf32, #tpu.memory_space<vmem>>, vector<8x128xf32>,
    return
  }
  func.func @transform_0(%arg0: i32) -> (i32, i32) {
    %c0_i32 = arith.constant 0 : i32
    %c0_i32_0 = arith.constant 0 : i32
    return %arg0, %c0_i32 : i32, i32
  }
  func.func @transform_1(%arg0: i32) -> (i32, i32) {
    %c0_i32 = arith.constant 0 : i32
    %c0_i32_0 = arith.constant 0 : i32
    %c0_i32_1 = arith.constant 0 : i32
    return %c0_i32, %c0_i32_0 : i32, i32
  }
  func.func @transform_2(%arg0: i32) -> (i32, i32) {
    %c0_i32 = arith.constant 0 : i32
    %c0_i32_0 = arith.constant 0 : i32
    %c0_i32_1 = arith.constant 0 : i32
    return %c0_i32, %c0_i32_0 : i32, i32
  }
  func.func @transform_3(%arg0: i32) -> (i32, i32) {
    %c0_i32 = arith.constant 0 : i32
    %c0_i32_0 = arith.constant 0 : i32
    %c0_i32_1 = arith.constant 0 : i32
    return %c0_i32, %c0_i32_0 : i32, i32
  }
  func.func @transform_4(%arg0: i32) -> (i32, i32) {
    %c0_i32 = arith.constant 0 : i32
    %c0_i32_0 = arith.constant 0 : i32
    %c0_i32_1 = arith.constant 0 : i32
    return %c0_i32, %c0_i32_0 : i32, i32
  }
  func.func @transform_5(%arg0: i32) -> (i32, i32) {
    %c0_i32 = arith.constant 0 : i32
    %c0_i32_0 = arith.constant 0 : i32
    %c0_i32_1 = arith.constant 0 : i32
    return %c0_i32, %c0_i32_0 : i32, i32
  }
  func.func @transform_6(%arg0: i32) -> (i32, i32) {
    %c0_i32 = arith.constant 0 : i32
    %c0_i32_0 = arith.constant 0 : i32
    %c0_i32_1 = arith.constant 0 : i32
    return %c0_i32, %c0_i32_0 : i32, i32
  }
  func.func @transform_7(%arg0: i32) -> (i32, i32) {
    %c0_i32 = arith.constant 0 : i32
    %c0_i32_0 = arith.constant 0 : i32
    return %c0_i32, %arg0 : i32, i32
  }
}

module attributes {stable_mosaic.version = 11 : i64} {
  func.func @_mlp_logsoftmax_kernel(%arg0: i32, %arg1: memref<128x30xf32, #tpu.memory_space<vmem>>, %arg2: memref<30x128xf32, #tpu.memory_space<vmem>>, %arg3: memref<1x128xf32, #tpu.memory_space<vmem>>, %arg4: memref<128x128xf32, #tpu.memory_space<vmem>>, %arg5: memref<1x128xf32, #tpu.memory_space<vmem>>, %arg6: memref<128x128xf32, #tpu.memory_space<vmem>>, %arg7: memref<1x128xf32, #tpu.memory_space<vmem>>, %arg8: memref<8x128xf32, #tpu.memory_space<vmem>>) attributes {dimension_semantics = [#tpu.dimension_semantics<parallel>], iteration_bounds = array<i64: 3>, scalar_prefetch = 0 : i64, scratch_operands = 0 : i64, tpu.core_type = #tpu.core_type<tc>, window_params = [{transform_indices = @transform_0, window_bounds = array<i64: 128, 30>}, {pipeline_mode = #tpu.pipeline_mode<synchronous>, transform_indices = @transform_1, window_bounds = array<i64: 30, 128>}, {pipeline_mode = #tpu.pipeline_mode<synchronous>, transform_indices = @transform_2, window_bounds = array<i64: 1, 128>}, {pipeline_mode = #tpu.pipeline_mode<synchronous>, transform_indices = @transform_3, window_bounds = array<i64: 128, 128>}, {pipeline_mode = #tpu.pipeline_mode<synchronous>, transform_indices = @transform_4, window_bounds = array<i64: 1, 128>}, {pipeline_mode = #tpu.pipeline_mode<synchronous>, transform_indices = @transform_5, window_bounds = array<i64: 128, 128>}, {pipeline_mode = #tpu.pipeline_mode<synchronous>, transform_indices = @transform_6, window_bounds = array<i64: 1, 128>}, {transform_indices = @transform_7, window_bounds = array<i64: 8, 128>}]} {
    %c0 = arith.constant 0 : index
    %c0_0 = arith.constant 0 : index
    %0 = vector.load %arg1[%c0, %c0_0] : memref<128x30xf32, #tpu.memory_space<vmem>>, vector<128x30xf32>
    %c0_1 = arith.constant 0 : index
    %c0_2 = arith.constant 0 : index
    %1 = vector.load %arg2[%c0_1, %c0_2] : memref<30x128xf32, #tpu.memory_space<vmem>>, vector<30x128xf32>
    %cst = arith.constant dense<0.000000e+00> : vector<128x128xf32>
    %2 = tpu.matmul %0, %1, %cst {dimension_numbers = #tpu.dot_dimension_numbers<[1], [0], [0], [1], [0, 0, 1, 1], [], []>} : vector<128x30xf32>, vector<30x128xf32>, vector<128x128xf32> -> vector<128x128xf32>
    %c0_3 = arith.constant 0 : index
    %c0_4 = arith.constant 0 : index
    %3 = vector.load %arg3[%c0_3, %c0_4] : memref<1x128xf32, #tpu.memory_space<vmem>>, vector<1x128xf32>
    %4 = vector.broadcast %3 : vector<1x128xf32> to vector<128x128xf32>
    %5 = arith.addf %2, %4 : vector<128x128xf32>
    %cst_5 = arith.constant 0.000000e+00 : f32
    %6 = vector.broadcast %cst_5 : f32 to vector<128x128xf32>
    %7 = arith.maximumf %5, %6 : vector<128x128xf32>
    %c0_6 = arith.constant 0 : index
    %c0_7 = arith.constant 0 : index
    %8 = vector.load %arg4[%c0_6, %c0_7] : memref<128x128xf32, #tpu.memory_space<vmem>>, vector<128x128xf32>
    %cst_8 = arith.constant dense<0.000000e+00> : vector<128x128xf32>
    %9 = tpu.matmul %7, %8, %cst_8 {dimension_numbers = #tpu.dot_dimension_numbers<[1], [0], [0], [1], [0, 0, 1, 1], [], []>} : vector<128x128xf32>, vector<128x128xf32>, vector<128x128xf32> -> vector<128x128xf32>
    %c0_9 = arith.constant 0 : index
    %c0_10 = arith.constant 0 : index
    %10 = vector.load %arg5[%c0_9, %c0_10] : memref<1x128xf32, #tpu.memory_space<vmem>>, vector<1x128xf32>
    %11 = vector.broadcast %10 : vector<1x128xf32> to vector<128x128xf32>
    %12 = arith.addf %9, %11 : vector<128x128xf32>
    %cst_11 = arith.constant 0.000000e+00 : f32
    %13 = vector.broadcast %cst_11 : f32 to vector<128x128xf32>
    %14 = arith.maximumf %12, %13 : vector<128x128xf32>
    %c0_12 = arith.constant 0 : index
    %c0_13 = arith.constant 0 : index
    %15 = vector.load %arg6[%c0_12, %c0_13] : memref<128x128xf32, #tpu.memory_space<vmem>>, vector<128x128xf32>
    %cst_14 = arith.constant dense<0.000000e+00> : vector<128x128xf32>
    %16 = tpu.matmul %14, %15, %cst_14 {dimension_numbers = #tpu.dot_dimension_numbers<[1], [0], [0], [1], [0, 0, 1, 1], [], []>} : vector<128x128xf32>, vector<128x128xf32>, vector<128x128xf32> -> vector<128x128xf32>
    %c0_15 = arith.constant 0 : index
    %c0_16 = arith.constant 0 : index
    %17 = vector.load %arg7[%c0_15, %c0_16] : memref<1x128xf32, #tpu.memory_space<vmem>>, vector<1x128xf32>
    %18 = vector.broadcast %17 : vector<1x128xf32> to vector<128x128xf32>
    %19 = arith.addf %16, %18 : vector<128x128xf32>
    %cst_17 = arith.constant dense<0xFF800000> : vector<128xf32>
    %20 = vector.multi_reduction <maximumf>, %19, %cst_17 [1] : vector<128x128xf32> to vector<128xf32>
    %21 = vector.shape_cast %20 : vector<128xf32> to vector<128x1xf32>
    %22 = vector.broadcast %21 : vector<128x1xf32> to vector<128x128xf32>
    %23 = arith.subf %19, %22 : vector<128x128xf32>
    %24 = math.exp %23 : vector<128x128xf32>
    %cst_18 = arith.constant dense<0.000000e+00> : vector<128xf32>
    %25 = vector.multi_reduction <add>, %24, %cst_18 [1] : vector<128x128xf32> to vector<128xf32>
    %26 = vector.shape_cast %25 : vector<128xf32> to vector<128x1xf32>
    %27 = math.log %26 : vector<128x1xf32>
    %28 = vector.broadcast %27 : vector<128x1xf32> to vector<128x128xf32>
    %29 = arith.subf %23, %28 : vector<128x128xf32>
    %30 = tpu.transpose %29, [1, 0] : vector<128x128xf32> -> vector<128x128xf32>
    %31 = vector.extract_strided_slice %30 {offsets = [0, 0], sizes = [8, 128], strides = [1, 1]} : vector<128x128xf32> to vector<8x128xf32>
    %c0_19 = arith.constant 0 : index
    %c0_20 = arith.constant 0 : index
    %32 = vector.load %arg8[%c0_19, %c0_20] : memref<8x128xf32, #tpu.memory_space<vmem>>, vector<8x128xf32>
    tpu.vector_store %arg8[%c0_19, %c0_20], %31 {strides = array<i32>} : memref<8x128xf32, #tpu.memory_space<vmem>>, vector<8x128xf32>,
    return
  }
  func.func @transform_0(%arg0: i32) -> (i32, i32) {
    %c0_i32 = arith.constant 0 : i32
    %c0_i32_0 = arith.constant 0 : i32
    return %arg0, %c0_i32 : i32, i32
  }
  func.func @transform_1(%arg0: i32) -> (i32, i32) {
    %c0_i32 = arith.constant 0 : i32
    %c0_i32_0 = arith.constant 0 : i32
    %c0_i32_1 = arith.constant 0 : i32
    return %c0_i32, %c0_i32_0 : i32, i32
  }
  func.func @transform_2(%arg0: i32) -> (i32, i32) {
    %c0_i32 = arith.constant 0 : i32
    %c0_i32_0 = arith.constant 0 : i32
    %c0_i32_1 = arith.constant 0 : i32
    return %c0_i32, %c0_i32_0 : i32, i32
  }
  func.func @transform_3(%arg0: i32) -> (i32, i32) {
    %c0_i32 = arith.constant 0 : i32
    %c0_i32_0 = arith.constant 0 : i32
    %c0_i32_1 = arith.constant 0 : i32
    return %c0_i32, %c0_i32_0 : i32, i32
  }
  func.func @transform_4(%arg0: i32) -> (i32, i32) {
    %c0_i32 = arith.constant 0 : i32
    %c0_i32_0 = arith.constant 0 : i32
    %c0_i32_1 = arith.constant 0 : i32
    return %c0_i32, %c0_i32_0 : i32, i32
  }
  func.func @transform_5(%arg0: i32) -> (i32, i32) {
    %c0_i32 = arith.constant 0 : i32
    %c0_i32_0 = arith.constant 0 : i32
    %c0_i32_1 = arith.constant 0 : i32
    return %c0_i32, %c0_i32_0 : i32, i32
  }
  func.func @transform_6(%arg0: i32) -> (i32, i32) {
    %c0_i32 = arith.constant 0 : i32
    %c0_i32_0 = arith.constant 0 : i32
    %c0_i32_1 = arith.constant 0 : i32
    return %c0_i32, %c0_i32_0 : i32, i32
  }
  func.func @transform_7(%arg0: i32) -> (i32, i32) {
    %c0_i32 = arith.constant 0 : i32
    %c0_i32_0 = arith.constant 0 : i32
    return %c0_i32, %arg0 : i32, i32
  }
}

</mosaic_0001>

<bundles_post_ra>
// kernel: tpu_custom_call.1
= control target key start
LH: loop header
LB: loop body
LE: loop exit
PB: predicated region body
PF: predicated region fallthrough
CT: control target
= control target key end

     0   :  { %12 = vsyncpa [#allocation3], 0  ;;  %s1518_s0 = inlined_call_operand.vmem [shape: f32[384,30], index: 0, kind: input, shape index: {}]   ;;  %s1519_s1 = inlined_call_operand.vmem [shape: f32[30,128], index: 1, kind: input, shape index: {}]   ;;  %s1520_s2 = inlined_call_operand.vmem [shape: f32[1,128], index: 2, kind: input, shape index: {}]   ;;  %s1521_s3 = inlined_call_operand.vmem [shape: f32[128,128], index: 3, kind: input, shape index: {}]   ;;  %s1522_s4 = inlined_call_operand.vmem [shape: f32[1,128], index: 4, kind: input, shape index: {}]   ;;  %s1523_s5 = inlined_call_operand.vmem [shape: f32[128,128], index: 5, kind: input, shape index: {}]   ;;  %s1524_s6 = inlined_call_operand.vmem [shape: f32[1,128], index: 6, kind: input, shape index: {}]   ;;  %s1525_s7 = inlined_call_operand.hbm [shape: f32[8,384], index: 7, kind: output, shape index: {}]  }
   0x1   :  { %14 = vsyncpa [#allocation3 + $0x1], 0  ;;  %s1161_s24 = smov 0   ;;  %s1163_s25 = smov 0  }
   0x2   :  { %s1165_s26 = smov 0   ;;  %s1167_s27 = smov 0  }
   0x3 LB: > { %s1182_s28 = sadd.s32 4294967295, %s1119_s27   ;;  %s891_s29 = sadd.s32 4294967294, %s1119_s27   ;;  %s1119_s27 = sphi %s1167_s27, %s1531_s27   ;;  %s1115_s26 = sphi %s1165_s26, %s1530_s26   ;;  %s1111_s25 = sphi %s1163_s25, %s1529_s25   ;;  %s1107_s24 = sphi %s1161_s24, %s1528_s24  }
   0x4   : > { %s1186_s30 = sadd.s32 1, %s1119_s27   ;;  %s179_s8 = sadd.s32 1, %s1115_s26 }
   0x5   : > { %s176_s9 = ssub.s32 %s1119_s27, %s1186_s30  ;;  %p189_p0 = scmp.ne.s32.totalorder %s1115_s26, %s1111_s25 }
   0x6   : > { %p177_p1 = scmp.eq.s32.totalorder %s176_s9, 0  ;;  %p190_p2 = scmp.eq.s32.totalorder %s1182_s28, 2 }
   0x7   : > { %p195_p3 = scmp.ne.s32.totalorder %s1111_s25, %s1107_s24  ;;  %p196_p4 = scmp.eq.s32.totalorder %s891_s29, 2 }
   0x8   : > { %s1197_s10 = scalar_select %p177_p1, %s1115_s26, %s179_s8  }
   0x9   : > { %p1199_p5 = por %p190_p2, %p189_p0  ;;  %p1203_p6 = por %p196_p4, %p195_p3 }
   0xa   : > { %p894_p7 = scmp.ge.s32.totalorder %s1119_s27, 1  ;;  %p241_p8 = scmp.lt.s32.totalorder %s1119_s27, 4 }
   0xc   : > { %p242_p9 = pnand %p894_p7, %p241_p8 }
   0xd   : > { %s896_s17 = sshll.u32 (!%p242_p9), %s1182_s28, 4  ;;  %s270_s14 = sand.u32 (!%p242_p9), 1, %s1111_s25  }
   0xe   : > { %245 = sbr.rel (%p242_p9) target bundleno = 856 (0x358), region = 48  ;;  %p274_p10 = scmp.lt.s32.totalorder (!%p242_p9), %s896_s17, 47 }
   0xf   : > { %s895_s15 = sshll.u32 (!%p242_p9), %s270_s14, 3  ;;  %s916_s16 = sshll.u32 (!%p242_p9), %s1182_s28, 3 }
  0x10   : > { %s827_s19 = scalar_lea.hbm (!%p242_p9), %s1525_s7, %s916_s16  ;;  %s1077_s13 = scalar_lea.hbm (!%p242_p9), %s1525_s7, 24 }
  0x11   : > { %s831_s21 = sshll.u32 (!%p242_p9), %s827_s19, 4  ;;  %s832_s21 = int_to_ptr.hbm [resolvable:$true] %s831_s21 }
  0x12   : > { %s1071_s23 = sshra.s32 (!%p242_p9), %s832_s21, 4  ;;  %s1072_s23 = int_to_ptr.hbm [resolvable:$true] %s1071_s23 }
  0x13   : > { %v298_v0 = vld [vmem:[%s1519_s1 + $0x18] sm:$0x3f]  ;;  %vm352_vm0 = vcmask 1045504   ;;  %v297_v1 = vld [vmem:[%s1519_s1 + $0x10] sm:$0xff]  ;;  %v296_v2 = vld [vmem:[%s1519_s1 + $0x8] sm:$0xff]  ;;  %s1533_s17 = smov (!%p274_p10, %s896_s17), 47  ;;  %p1078_p0 = scmp.lt.s32.totalorder %s1072_s23, %s1525_s7 }
  0x14   : > { %898 = vmatpush.msk.msra.mxu0 %vm352_vm0, %v298_v0  ;;  %v295_v3 = vld [vmem:[%s1519_s1] sm:$0xff]  ;;  %s897_s22 = sshll.u32 %s1533_s17, 3  ;;  %vm303_vm1 = vcmask 244736   ;;  %v452_v13 = vld [vmem:[%s1521_s3 + $0x78] sm:$0xff]  ;;  %v451_v14 = vld [vmem:[%s1521_s3 + $0x70] sm:$0xff]  ;;  %s1073_s29 = scalar_lea.hbm %s1072_s23, 8 }
  0x15   : > { %s1225_s8 = scalar_lea.vmem %s1518_s0, %s897_s22  ;;  %457 = vmatpush.msra.mxu1 %v452_v13  ;;  %919 = vmatpush.msra.mxu3 %v452_v13  ;;  %v450_v15 = vld [vmem:[%s1521_s3 + $0x68] sm:$0xff]  ;;  %v449_v17 = vld [vmem:[%s1521_s3 + $0x60] sm:$0xff]  ;;  %v448_v18 = vld [vmem:[%s1521_s3 + $0x58] sm:$0xff]  ;;  %s817_s22 = scalar_lea.sflag [#allocation3], %s270_s14 }
  0x16   : > { %369 = vmatpush.msra.mxu0 %v297_v1  ;;  %v279_v4 = vld [vmem:[%s1225_s8] sm:$0xff]  ;;  %v280_v5 = vld [vmem:[%s1225_s8 + $0x8] sm:$0xff]  ;;  %v281_v6 = vld [vmem:[%s1225_s8 + $0x10] sm:$0xff]  ;;  %p1074_p11 = scmp.ne.s32.totalorder %s1072_s23, %s1073_s29  ;;  %p1079_p1 = scmp.lt.s32.totalorder %s1077_s13, %s1073_s29 }
  0x17   : > { %v282_v7 = vld [vmem:[%s1225_s8 + $0x18] sm:$0xff]  ;;  %v283_v8 = vld [vmem:[%s1225_s8 + $0x20] sm:$0xff]  ;;  %v284_v9 = vld [vmem:[%s1225_s8 + $0x28] sm:$0xff]  ;;  %458 = vmatpush.msra.mxu1 %v451_v14  ;;  %920 = vmatpush.msra.mxu3 %v451_v14 }
  0x18   : > { %370 = vmatpush.msra.mxu0 %v296_v2  ;;  %v285_v10 = vld [vmem:[%s1225_s8 + $0x30] sm:$0xff]  ;;  %v286_v11 = vld [vmem:[%s1225_s8 + $0x38] sm:$0xff]  ;;  %v287_v12 = vld [vmem:[%s1225_s8 + $0x40] sm:$0xff]  ;;  %p1075_p12 = pnand %p1074_p11, %p1199_p5  ;;  %p1080_p2 = por %p1079_p1, %p1078_p0 }
  0x19   : > { %v288_v16 = vld [vmem:[%s1225_s8 + $0x48] sm:$0xff]  ;;  %459 = vmatpush.msra.mxu1 %v450_v15  ;;  %921 = vmatpush.msra.mxu3 %v450_v15  ;;  %v447_v19 = vld [vmem:[%s1521_s3 + $0x50] sm:$0xff]  ;;  %v445_v22 = vld [vmem:[%s1521_s3 + $0x40] sm:$0xff] }
  0x1a   : > { %371 = vmatpush.msra.mxu0 %v295_v3  ;;  %v446_v20 = vld [vmem:[%s1521_s3 + $0x48] sm:$0xff]  ;;  %v289_v21 = vld [vmem:[%s1225_s8 + $0x50] sm:$0xff]  ;;  %v444_v23 = vld [vmem:[%s1521_s3 + $0x38] sm:$0xff]  ;;  %p1076_p13 = pneg %p1075_p12 }
  0x1b   : > { %899 = vmatmul.msk.f32.vlgmr.msra.gmra.mxu0 %vm303_vm1, %v279_v4  ;;  %460 = vmatpush.msra.mxu1 %v449_v17  ;;  %v443_v24 = vld [vmem:[%s1521_s3 + $0x30] sm:$0xff]  ;;  %v442_v25 = vld [vmem:[%s1521_s3 + $0x28] sm:$0xff]  ;;  %v290_v26 = vld [vmem:[%s1225_s8 + $0x58] sm:$0xff] }
  0x1c   : > { %922 = vmatpush.msra.mxu3 %v449_v17  ;;  %v441_v27 = vld [vmem:[%s1521_s3 + $0x20] sm:$0xff]  ;;  %v440_v28 = vld [vmem:[%s1521_s3 + $0x18] sm:$0xff]  ;;  %v439_v29 = vld [vmem:[%s1521_s3 + $0x10] sm:$0xff]  ;;  %p1081_p3 = pnand %p1080_p2, %p1076_p13 }
  0x1d   : > { %461 = vmatpush.msra.mxu1 %v448_v18  ;;  %v291_v30 = vld [vmem:[%s1225_s8 + $0x60] sm:$0xff]  ;;  %v438_v31 = vld [vmem:[%s1521_s3 + $0x8] sm:$0xff]  ;;  %v293_v34 = vld [vmem:[%s1225_s8 + $0x70] sm:$0xff] }
  0x1e   : > { %923 = vmatpush.msra.mxu3 %v448_v18  ;;  %v437_v32 = vld [vmem:[%s1521_s3] sm:$0xff]  ;;  %v292_v33 = vld [vmem:[%s1225_s8 + $0x68] sm:$0xff]  ;;  %v294_v35 = vld [vmem:[%s1225_s8 + $0x78] sm:$0xff]  ;;  %s272_s8 = scalar_lea.vmem [#allocation2], %s895_s15 }
  0x1f   : > { %462 = vmatpush.msra.mxu1 %v447_v19  ;;  %v1310_v36 = vld [vmem:[%s1520_s2] ss:$0 sm:$0xff]  ;;  %v553_v0 = vld [vmem:[%s1523_s5 + $0x78] sm:$0xff]  ;;  %v552_v3 = vld [vmem:[%s1523_s5 + $0x70] sm:$0xff]  ;;  %s829_s20 = sshll.u32 %s272_s8, 4  ;;  %s830_s20 = int_to_ptr.vmem [resolvable:$true] %s829_s20 }
  0x20   : > { %924 = vmatpush.msra.mxu3 %v447_v19  ;;  %558 = vmatpush.msra.mxu2 %v553_v0  ;;  %v546_v13 = vld [vmem:[%s1523_s5 + $0x40] sm:$0xff]  ;;  %v545_v14 = vld [vmem:[%s1523_s5 + $0x38] sm:$0xff]  ;;  %v544_v17 = vld [vmem:[%s1523_s5 + $0x30] sm:$0xff] }
  0x21   : > { %463 = vmatpush.msra.mxu1 %v446_v20  ;;  %v543_v19 = vld [vmem:[%s1523_s5 + $0x28] sm:$0xff] }
  0x22   : > { %925 = vmatpush.msra.mxu3 %v446_v20  ;;  %559 = vmatpush.msra.mxu2 %v552_v3  ;;  %v542_v20 = vld [vmem:[%s1523_s5 + $0x20] sm:$0xff] }
  0x23   : > { %900 = vmatmul.msk.f32.gmra.mxu0 %vm303_vm1, %v280_v5  ;;  %464 = vmatpush.msra.mxu1 %v445_v22  ;;  %v551_v5 = vld [vmem:[%s1523_s5 + $0x68] sm:$0xff] }
  0x24   : > { %926 = vmatpush.msra.mxu3 %v445_v22  ;;  %560 = vmatpush.msra.mxu2 %v551_v5 }
  0x25   : > { %465 = vmatpush.msra.mxu1 %v444_v23 }
  0x26   : > { %927 = vmatpush.msra.mxu3 %v444_v23 }
  0x27   : > { %466 = vmatpush.msra.mxu1 %v443_v24 }
  0x28   : > { %928 = vmatpush.msra.mxu3 %v443_v24  ;;  %v540_v24 = vld [vmem:[%s1523_s5 + $0x10] sm:$0xff] }
  0x29   : > { %467 = vmatpush.msra.mxu1 %v442_v25 }
  0x2a   : > { %929 = vmatpush.msra.mxu3 %v442_v25 }
  0x2b   : > { %901 = vmatmul.msk.f32.gmra.mxu0 %vm303_vm1, %v281_v6  ;;  %468 = vmatpush.msra.mxu1 %v441_v27  ;;  %v550_v6 = vld [vmem:[%s1523_s5 + $0x60] sm:$0xff] }
  0x2c   : > { %930 = vmatpush.msra.mxu3 %v441_v27  ;;  %561 = vmatpush.msra.mxu2 %v550_v6  ;;  %v538_v27 = vld [vmem:[%s1523_s5] sm:$0xff] }
  0x2d   : > { %469 = vmatpush.msra.mxu1 %v440_v28 }
  0x2e   : > { %931 = vmatpush.msra.mxu3 %v440_v28 }
  0x2f   : > { %470 = vmatpush.msra.mxu1 %v439_v29 }
  0x30   : > { %932 = vmatpush.msra.mxu3 %v439_v29 }
  0x31   : > { %471 = vmatpush.msra.mxu1 %v438_v31 }
  0x32   : > { %933 = vmatpush.msra.mxu3 %v438_v31 }
  0x33   : > { %902 = vmatmul.msk.f32.gmra.mxu0 %vm303_vm1, %v282_v7  ;;  %472 = vmatpush.msra.mxu1 %v437_v32  ;;  %v549_v7 = vld [vmem:[%s1523_s5 + $0x58] sm:$0xff] }
  0x34   : > { %934 = vmatpush.msra.mxu3 %v437_v32  ;;  %562 = vmatpush.msra.mxu2 %v549_v7 }
  0x36   : > { %935 = vmatpush.msrb.mxu3 %v553_v0 }
  0x38   : > { %936 = vmatpush.msrb.mxu3 %v552_v3 }
  0x3a   : > { %937 = vmatpush.msrb.mxu3 %v551_v5 }
  0x3b   : > { %903 = vmatmul.msk.f32.gmra.mxu0 %vm303_vm1, %v283_v8 }
  0x3c   : > { %938 = vmatpush.msrb.mxu3 %v550_v6 }
  0x3e   : > { %939 = vmatpush.msrb.mxu3 %v549_v7 }
  0x43   : > { %904 = vmatmul.msk.f32.gmra.mxu0 %vm303_vm1, %v284_v9 }
  0x4b   : > { %905 = vmatmul.msk.f32.gmra.mxu0 %vm303_vm1, %v285_v10  ;;  %v548_v10 = vld [vmem:[%s1523_s5 + $0x50] sm:$0xff] }
  0x4c   : > { %563 = vmatpush.msra.mxu2 %v548_v10  ;;  %940 = vmatpush.msrb.mxu3 %v548_v10 }
  0x53   : > { %906 = vmatmul.msk.f32.gmra.mxu0 %vm303_vm1, %v286_v11 }
  0x5b   : > { %907 = vmatmul.msk.f32.gmra.mxu0 %vm303_vm1, %v287_v12  ;;  %v547_v12 = vld [vmem:[%s1523_s5 + $0x48] sm:$0xff] }
  0x5c   : > { %564 = vmatpush.msra.mxu2 %v547_v12  ;;  %941 = vmatpush.msrb.mxu3 %v547_v12 }
  0x5e   : > { %565 = vmatpush.msra.mxu2 %v546_v13  ;;  %942 = vmatpush.msrb.mxu3 %v546_v13 }
  0x60   : > { %566 = vmatpush.msra.mxu2 %v545_v14  ;;  %943 = vmatpush.msrb.mxu3 %v545_v14 }
  0x62   : > { %567 = vmatpush.msra.mxu2 %v544_v17  ;;  %944 = vmatpush.msrb.mxu3 %v544_v17 }
  0x63   : > { %908 = vmatmul.msk.f32.gmra.mxu0 %vm303_vm1, %v288_v16 }
  0x64   : > { %568 = vmatpush.msra.mxu2 %v543_v19  ;;  %945 = vmatpush.msrb.mxu3 %v543_v19 }
  0x66   : > { %569 = vmatpush.msra.mxu2 %v542_v20  ;;  %946 = vmatpush.msrb.mxu3 %v542_v20 }
  0x6b   : > { %909 = vmatmul.msk.f32.gmra.mxu0 %vm303_vm1, %v289_v21  ;;  %v541_v21 = vld [vmem:[%s1523_s5 + $0x18] sm:$0xff] }
  0x6c   : > { %570 = vmatpush.msra.mxu2 %v541_v21  ;;  %947 = vmatpush.msrb.mxu3 %v541_v21 }
  0x6e   : > { %571 = vmatpush.msra.mxu2 %v540_v24  ;;  %948 = vmatpush.msrb.mxu3 %v540_v24 }
  0x73   : > { %910 = vmatmul.msk.f32.gmra.mxu0 %vm303_vm1, %v290_v26  ;;  %v539_v26 = vld [vmem:[%s1523_s5 + $0x8] sm:$0xff] }
  0x74   : > { %572 = vmatpush.msra.mxu2 %v539_v26  ;;  %949 = vmatpush.msrb.mxu3 %v539_v26 }
  0x76   : > { %573 = vmatpush.msra.mxu2 %v538_v27  ;;  %950 = vmatpush.msrb.mxu3 %v538_v27 }
  0x7b   : > { %911 = vmatmul.msk.f32.gmra.mxu0 %vm303_vm1, %v291_v30 }
  0x83   : > { %912 = vmatmul.msk.f32.gmra.mxu0 %vm303_vm1, %v292_v33 }
  0x8b   : > { %913 = vmatmul.msk.f32.gmra.mxu0 %vm303_vm1, %v293_v34 }
  0x93   : > { %914 = vmatmul.msk.f32.gmra.mxu0 %vm303_vm1, %v294_v35 }
  0x98   : > { %v373_v37 = vpop.f32.mrf.mxu0 }
  0x99   : > { %v374_v38 = vadd.f32 %v1310_v36, %v373_v37 }
  0x9b   : > { %v421_v39 = vmax.f32 %v374_v38, 0.0  ;;  %v991_v38 = vld [vmem:[%s1522_s4] ss:$0 sm:$0xff] }
  0x9d   : > { %473 = vmatmul.f32.vlgmr.msra.gmra.mxu1 %v421_v39 }
  0xa0   : > { %v376_v40 = vpop.f32.mrf.mxu0 }
  0xa1   : > { %v377_v41 = vadd.f32 %v1310_v36, %v376_v40 }
  0xa3   : > { %v422_v42 = vmax.f32 %v377_v41, 0.0 }
  0xa5   : > { %476 = vmatmul.f32.gmra.mxu1 %v422_v42 }
  0xa8   : > { %v379_v43 = vpop.f32.mrf.mxu0 }
  0xa9   : > { %v380_v44 = vadd.f32 %v1310_v36, %v379_v43 }
  0xab   : > { %v423_v45 = vmax.f32 %v380_v44, 0.0 }
  0xad   : > { %479 = vmatmul.f32.gmra.mxu1 %v423_v45 }
  0xb0   : > { %v382_v46 = vpop.f32.mrf.mxu0 }
  0xb1   : > { %v383_v47 = vadd.f32 %v1310_v36, %v382_v46 }
  0xb3   : > { %v424_v48 = vmax.f32 %v383_v47, 0.0 }
  0xb5   : > { %482 = vmatmul.f32.gmra.mxu1 %v424_v48 }
  0xb8   : > { %v385_v49 = vpop.f32.mrf.mxu0 }
  0xb9   : > { %v386_v50 = vadd.f32 %v1310_v36, %v385_v49 }
  0xbb   : > { %v425_v51 = vmax.f32 %v386_v50, 0.0 }
  0xbd   : > { %485 = vmatmul.f32.gmra.mxu1 %v425_v51 }
  0xc0   : > { %v388_v52 = vpop.f32.mrf.mxu0 }
  0xc1   : > { %v389_v53 = vadd.f32 %v1310_v36, %v388_v52 }
  0xc3   : > { %v426_v54 = vmax.f32 %v389_v53, 0.0 }
  0xc5   : > { %488 = vmatmul.f32.gmra.mxu1 %v426_v54 }
  0xc8   : > { %v391_v55 = vpop.f32.mrf.mxu0 }
  0xc9   : > { %v392_v56 = vadd.f32 %v1310_v36, %v391_v55 }
  0xcb   : > { %v427_v57 = vmax.f32 %v392_v56, 0.0 }
  0xcd   : > { %491 = vmatmul.f32.gmra.mxu1 %v427_v57 }
  0xd0   : > { %v394_v58 = vpop.f32.mrf.mxu0 }
  0xd1   : > { %v395_v59 = vadd.f32 %v1310_v36, %v394_v58 }
  0xd3   : > { %v428_v60 = vmax.f32 %v395_v59, 0.0 }
  0xd5   : > { %494 = vmatmul.f32.gmra.mxu1 %v428_v60 }
  0xd8   : > { %v397_v61 = vpop.f32.mrf.mxu0 }
  0xd9   : > { %v398_v62 = vadd.f32 %v1310_v36, %v397_v61 }
  0xdb   : > { %v429_v63 = vmax.f32 %v398_v62, 0.0 }
  0xdd   : > { %497 = vmatmul.f32.gmra.mxu1 %v429_v63 }
  0xe0   : > { %v400_v1 = vpop.f32.mrf.mxu0 }
  0xe1   : > { %v401_v2 = vadd.f32 %v1310_v36, %v400_v1 }
  0xe3   : > { %v430_v4 = vmax.f32 %v401_v2, 0.0 }
  0xe5   : > { %500 = vmatmul.f32.gmra.mxu1 %v430_v4 }
  0xe8   : > { %v403_v8 = vpop.f32.mrf.mxu0 }
  0xe9   : > { %v404_v9 = vadd.f32 %v1310_v36, %v403_v8 }
  0xeb   : > { %v431_v11 = vmax.f32 %v404_v9, 0.0 }
  0xed   : > { %503 = vmatmul.f32.gmra.mxu1 %v431_v11 }
  0xf0   : > { %v406_v15 = vpop.f32.mrf.mxu0 }
  0xf1   : > { %v407_v16 = vadd.f32 %v1310_v36, %v406_v15 }
  0xf3   : > { %v432_v18 = vmax.f32 %v407_v16, 0.0 }
  0xf5   : > { %506 = vmatmul.f32.gmra.mxu1 %v432_v18 }
  0xf8   : > { %v409_v22 = vpop.f32.mrf.mxu0 }
  0xf9   : > { %v410_v23 = vadd.f32 %v1310_v36, %v409_v22  ;;  %v992_v22 = vld [vmem:[%s1524_s6] ss:$0 sm:$0xff] }
  0xfb   : > { %v433_v25 = vmax.f32 %v410_v23, 0.0 }
  0xfd   : > { %509 = vmatmul.f32.vlgmr.msra.gmra.mxu3 %v433_v25 }
 0x100   : > { %v412_v28 = vpop.f32.mrf.mxu0 }
 0x101   : > { %v413_v29 = vadd.f32 %v1310_v36, %v412_v28 }
 0x103   : > { %v434_v30 = vmax.f32 %v413_v29, 0.0 }
 0x105   : > { %512 = vmatmul.f32.gmra.mxu3 %v434_v30 }
 0x108   : > { %v415_v31 = vpop.f32.mrf.mxu0 }
 0x109   : > { %v416_v32 = vadd.f32 %v1310_v36, %v415_v31 }
 0x10b   : > { %v435_v33 = vmax.f32 %v416_v32, 0.0 }
 0x10d   : > { %515 = vmatmul.f32.gmra.mxu3 %v435_v33 }
 0x110   : > { %v418_v34 = vpop.f32.mrf.mxu0 }
 0x111   : > { %v419_v35 = vadd.f32 %v1310_v36, %v418_v34 }
 0x113   : > { %v436_v37 = vmax.f32 %v419_v35, 0.0 }
 0x115   : > { %518 = vmatmul.f32.gmra.mxu3 %v436_v37 }
 0x11a   : > { %v474_v39 = vpop.f32.mrf.mxu1 }
 0x11b   : > { %v475_v40 = vadd.f32 %v991_v38, %v474_v39 }
 0x11d   : > { %v522_v41 = vmax.f32 %v475_v40, 0.0 }
 0x11f   : > { %574 = vmatmul.f32.vlgmr.msra.gmra.mxu2 %v522_v41 }
 0x122   : > { %v477_v42 = vpop.f32.mrf.mxu1 }
 0x123   : > { %v478_v43 = vadd.f32 %v991_v38, %v477_v42 }
 0x125   : > { %v523_v44 = vmax.f32 %v478_v43, 0.0 }
 0x127   : > { %577 = vmatmul.f32.gmra.mxu2 %v523_v44 }
 0x12a   : > { %v480_v45 = vpop.f32.mrf.mxu1 }
 0x12b   : > { %v481_v46 = vadd.f32 %v991_v38, %v480_v45 }
 0x12d   : > { %v524_v47 = vmax.f32 %v481_v46, 0.0 }
 0x12f   : > { %580 = vmatmul.f32.gmra.mxu2 %v524_v47 }
 0x132   : > { %v483_v48 = vpop.f32.mrf.mxu1 }
 0x133   : > { %v484_v36 = vadd.f32 %v991_v38, %v483_v48 }
 0x135   : > { %v525_v49 = vmax.f32 %v484_v36, 0.0 }
 0x137   : > { %583 = vmatmul.f32.gmra.mxu2 %v525_v49 }
 0x13a   : > { %v486_v50 = vpop.f32.mrf.mxu1 }
 0x13b   : > { %v487_v51 = vadd.f32 %v991_v38, %v486_v50 }
 0x13d   : > { %v526_v52 = vmax.f32 %v487_v51, 0.0 }
 0x13f   : > { %586 = vmatmul.f32.gmra.mxu2 %v526_v52 }
 0x142   : > { %v489_v53 = vpop.f32.mrf.mxu1 }
 0x143   : > { %v490_v54 = vadd.f32 %v991_v38, %v489_v53 }
 0x145   : > { %v527_v55 = vmax.f32 %v490_v54, 0.0 }
 0x147   : > { %589 = vmatmul.f32.gmra.mxu2 %v527_v55 }
 0x14a   : > { %v492_v56 = vpop.f32.mrf.mxu1 }
 0x14b   : > { %v493_v57 = vadd.f32 %v991_v38, %v492_v56 }
 0x14d   : > { %v528_v58 = vmax.f32 %v493_v57, 0.0 }
 0x14f   : > { %592 = vmatmul.f32.gmra.mxu2 %v528_v58 }
 0x152   : > { %v495_v59 = vpop.f32.mrf.mxu1 }
 0x153   : > { %v496_v60 = vadd.f32 %v991_v38, %v495_v59 }
 0x155   : > { %v529_v61 = vmax.f32 %v496_v60, 0.0 }
 0x157   : > { %595 = vmatmul.f32.gmra.mxu2 %v529_v61 }
 0x15a   : > { %v498_v62 = vpop.f32.mrf.mxu1 }
 0x15b   : > { %v499_v63 = vadd.f32 %v991_v38, %v498_v62 }
 0x15d   : > { %v530_v0 = vmax.f32 %v499_v63, 0.0 }
 0x15f   : > { %598 = vmatmul.f32.gmra.mxu2 %v530_v0 }
 0x162   : > { %v501_v1 = vpop.f32.mrf.mxu1 }
 0x163   : > { %v502_v2 = vadd.f32 %v991_v38, %v501_v1 }
 0x165   : > { %v531_v3 = vmax.f32 %v502_v2, 0.0 }
 0x167   : > { %601 = vmatmul.f32.gmra.mxu2 %v531_v3 }
 0x16a   : > { %v504_v4 = vpop.f32.mrf.mxu1 }
 0x16b   : > { %v505_v5 = vadd.f32 %v991_v38, %v504_v4 }
 0x16d   : > { %v532_v6 = vmax.f32 %v505_v5, 0.0 }
 0x16f   : > { %604 = vmatmul.f32.gmra.mxu2 %v532_v6 }
 0x172   : > { %v507_v7 = vpop.f32.mrf.mxu1 }
 0x173   : > { %v508_v8 = vadd.f32 %v991_v38, %v507_v7 }
 0x175   : > { %v533_v9 = vmax.f32 %v508_v8, 0.0 }
 0x177   : > { %607 = vmatmul.f32.gmra.mxu2 %v533_v9 }
 0x180   : > { %v510_v10 = vpop.f32.mrf.mxu3 }
 0x181   : > { %v511_v11 = vadd.f32 %v991_v38, %v510_v10 }
 0x183   : > { %v534_v12 = vmax.f32 %v511_v11, 0.0 }
 0x185   : > { %610 = vmatmul.f32.vlgmr.msrb.gmra.mxu3 %v534_v12 }
 0x188   : > { %v513_v13 = vpop.f32.mrf.mxu3 }
 0x189   : > { %v514_v14 = vadd.f32 %v991_v38, %v513_v13 }
 0x18b   : > { %v535_v15 = vmax.f32 %v514_v14, 0.0 }
 0x18d   : > { %613 = vmatmul.f32.gmra.mxu3 %v535_v15 }
 0x190   : > { %v516_v16 = vpop.f32.mrf.mxu3 }
 0x191   : > { %v517_v17 = vadd.f32 %v991_v38, %v516_v16 }
 0x193   : > { %v536_v18 = vmax.f32 %v517_v17, 0.0 }
 0x195   : > { %616 = vmatmul.f32.gmra.mxu3 %v536_v18 }
 0x198   : > { %v519_v19 = vpop.f32.mrf.mxu3 }
 0x199   : > { %v520_v20 = vadd.f32 %v991_v38, %v519_v19 }
 0x19b   : > { %v537_v21 = vmax.f32 %v520_v20, 0.0 }
 0x19d   : > { %619 = vmatmul.f32.gmra.mxu3 %v537_v21 }
 0x1a2   : > { %v575_v23 = vpop.f32.mrf.mxu2 }
 0x1a3   : > { %v576_v24 = vadd.f32 %v992_v22, %v575_v23 }
 0x1a5   : > { %623 = vmax.xlane.f32.xlu0 %v576_v24 }
 0x1aa   : > { %v578_v25 = vpop.f32.mrf.mxu2 }
 0x1ab   : > { %v579_v26 = vadd.f32 %v992_v22, %v578_v25 }
 0x1ad   : > { %625 = vmax.xlane.f32.xlu0 %v579_v26 }
 0x1b2   : > { %v581_v27 = vpop.f32.mrf.mxu2 }
 0x1b3   : > { %v582_v28 = vadd.f32 %v992_v22, %v581_v27 }
 0x1b5   : > { %627 = vmax.xlane.f32.xlu1 %v582_v28 }
 0x1ba   : > { %v584_v29 = vpop.f32.mrf.mxu2 }
 0x1bb   : > { %v585_v30 = vadd.f32 %v992_v22, %v584_v29 }
 0x1bd   : > { %629 = vmax.xlane.f32.xlu1 %v585_v30 }
 0x1c2   : > { %v587_v31 = vpop.f32.mrf.mxu2 }
 0x1c3   : > { %v588_v32 = vadd.f32 %v992_v22, %v587_v31 }
 0x1c5   : > { %631 = vmax.xlane.f32.xlu2 %v588_v32 }
 0x1ca   : > { %v590_v33 = vpop.f32.mrf.mxu2 }
 0x1cb   : > { %v591_v34 = vadd.f32 %v992_v22, %v590_v33 }
 0x1cd   : > { %633 = vmax.xlane.f32.xlu2 %v591_v34 }
 0x1d2   : > { %v593_v35 = vpop.f32.mrf.mxu2 }
 0x1d3   : > { %v1382_v37 = vadd.f32 %v992_v22, %v593_v35 }
 0x1d5   : > { %635 = vmax.xlane.f32.xlu0 %v1382_v37 }
 0x1da   : > { %v596_v38 = vpop.f32.mrf.mxu2 }
 0x1db   : > { %v1385_v39 = vadd.f32 %v992_v22, %v596_v38 }
 0x1dd   : > { %637 = vmax.xlane.f32.xlu1 %v1385_v39 }
 0x1e2   : > { %v599_v40 = vpop.f32.mrf.mxu2 }
 0x1e3   : > { %v1388_v41 = vadd.f32 %v992_v22, %v599_v40 }
 0x1e5   : > { %639 = vmax.xlane.f32.xlu2 %v1388_v41 }
 0x1ea   : > { %v602_v42 = vpop.f32.mrf.mxu2 }
 0x1eb   : > { %v1391_v43 = vadd.f32 %v992_v22, %v602_v42 }
 0x1ed   : > { %641 = vmax.xlane.f32.xlu0 %v1391_v43 }
 0x1f2   : > { %v605_v44 = vpop.f32.mrf.mxu2 }
 0x1f3   : > { %v1394_v45 = vadd.f32 %v992_v22, %v605_v44 }
 0x1f5   : > { %643 = vmax.xlane.f32.xlu1 %v1394_v45 }
 0x1fa   : > { %v608_v46 = vpop.f32.mrf.mxu2 }
 0x1fb   : > { %v1397_v47 = vadd.f32 %v992_v22, %v608_v46 }
 0x1fd   : > { %645 = vmax.xlane.f32.xlu2 %v1397_v47 }
 0x208   : > { %v611_v48 = vpop.f32.mrf.mxu3 }
 0x209   : > { %v1400_v36 = vadd.f32 %v992_v22, %v611_v48 }
 0x20b   : > { %647 = vmax.xlane.f32.xlu0 %v1400_v36 }
 0x210   : > { %v614_v49 = vpop.f32.mrf.mxu3 }
 0x211   : > { %v1403_v50 = vadd.f32 %v992_v22, %v614_v49 }
 0x213   : > { %649 = vmax.xlane.f32.xlu1 %v1403_v50 }
 0x218   : > { %v617_v51 = vpop.f32.mrf.mxu3  ;;  %v624_v52 = vpop.xlane.xlu0 %623 }
 0x219   : > { %v1406_v53 = vadd.f32 %v992_v22, %v617_v51  ;;  %v1408_v54 = vsub.f32 %v576_v24, %v624_v52 }
 0x21b   : > { %v671_v55 = vmul.f32 1.442695, %v1408_v54  ;;  %651 = vmax.xlane.f32.xlu2 %v1406_v53 }
 0x21d   : > { %993 = vpow2.f32 %v671_v55 }
 0x220   : > { %v620_v56 = vpop.f32.mrf.mxu3  ;;  %v626_v57 = vpop.xlane.xlu0 %625 }
 0x221   : > { %v1412_v58 = vadd.f32 %v992_v22, %v620_v56  ;;  %v1414_v59 = vsub.f32 %v579_v26, %v626_v57 }
 0x223   : > { %v994_v60 = vpop.eup %993  ;;  %v673_v61 = vmul.f32 1.442695, %v1414_v59  ;;  %653 = vmax.xlane.f32.xlu0 %v1412_v58 }
 0x224   : > { %703 = vadd.xlane.f32.xlu1 %v994_v60 }
 0x225   : > { %995 = vpow2.f32 %v673_v61 }
 0x228   : > { %v628_v62 = vpop.xlane.xlu1 %627 }
 0x229   : > { %v1418_v63 = vsub.f32 %v582_v28, %v628_v62 }
 0x22b   : > { %v996_v0 = vpop.eup %995  ;;  %v675_v1 = vmul.f32 1.442695, %v1418_v63 }
 0x22c   : > { %705 = vadd.xlane.f32.xlu2 %v996_v0 }
 0x22d   : > { %997 = vpow2.f32 %v675_v1 }
 0x230   : > { %v630_v2 = vpop.xlane.xlu1 %629 }
 0x231   : > { %v1421_v3 = vsub.f32 %v585_v30, %v630_v2 }
 0x233   : > { %v998_v4 = vpop.eup %997  ;;  %v677_v5 = vmul.f32 1.442695, %v1421_v3 }
 0x234   : > { %707 = vadd.xlane.f32.xlu0 %v998_v4 }
 0x235   : > { %999 = vpow2.f32 %v677_v5 }
 0x238   : > { %v632_v6 = vpop.xlane.xlu2 %631 }
 0x239   : > { %v1424_v7 = vsub.f32 %v588_v32, %v632_v6 }
 0x23b   : > { %v1000_v8 = vpop.eup %999  ;;  %v679_v9 = vmul.f32 1.442695, %v1424_v7 }
 0x23c   : > { %709 = vadd.xlane.f32.xlu1 %v1000_v8 }
 0x23d   : > { %1001 = vpow2.f32 %v679_v9 }
 0x240   : > { %v634_v10 = vpop.xlane.xlu2 %633 }
 0x241   : > { %v1427_v11 = vsub.f32 %v591_v34, %v634_v10 }
 0x243   : > { %v1002_v12 = vpop.eup %1001  ;;  %v681_v13 = vmul.f32 1.442695, %v1427_v11 }
 0x244   : > { %711 = vadd.xlane.f32.xlu2 %v1002_v12 }
 0x245   : > { %1003 = vpow2.f32 %v681_v13 }
 0x248   : > { %v636_v14 = vpop.xlane.xlu0 %635 }
 0x249   : > { %v1431_v15 = vsub.f32 %v1382_v37, %v636_v14 }
 0x24b   : > { %v1004_v16 = vpop.eup %1003  ;;  %v683_v17 = vmul.f32 1.442695, %v1431_v15 }
 0x24c   : > { %713 = vadd.xlane.f32.xlu0 %v1004_v16 }
 0x24d   : > { %1005 = vpow2.f32 %v683_v17 }
 0x250   : > { %v638_v18 = vpop.xlane.xlu1 %637 }
 0x251   : > { %v1435_v19 = vsub.f32 %v1385_v39, %v638_v18 }
 0x253   : > { %v1006_v20 = vpop.eup %1005  ;;  %v685_v21 = vmul.f32 1.442695, %v1435_v19 }
 0x254   : > { %715 = vadd.xlane.f32.xlu1 %v1006_v20 }
 0x255   : > { %1007 = vpow2.f32 %v685_v21 }
 0x258   : > { %v640_v22 = vpop.xlane.xlu2 %639 }
 0x259   : > { %v1439_v23 = vsub.f32 %v1388_v41, %v640_v22 }
 0x25b   : > { %v1008_v24 = vpop.eup %1007  ;;  %v687_v25 = vmul.f32 1.442695, %v1439_v23 }
 0x25c   : > { %717 = vadd.xlane.f32.xlu2 %v1008_v24 }
 0x25d   : > { %1009 = vpow2.f32 %v687_v25 }
 0x260   : > { %v642_v26 = vpop.xlane.xlu0 %641 }
 0x261   : > { %v1443_v27 = vsub.f32 %v1391_v43, %v642_v26 }
 0x263   : > { %v1010_v28 = vpop.eup %1009  ;;  %v689_v29 = vmul.f32 1.442695, %v1443_v27 }
 0x264   : > { %719 = vadd.xlane.f32.xlu0 %v1010_v28 }
 0x265   : > { %1011 = vpow2.f32 %v689_v29 }
 0x268   : > { %v644_v30 = vpop.xlane.xlu1 %643 }
 0x269   : > { %v1447_v31 = vsub.f32 %v1394_v45, %v644_v30 }
 0x26b   : > { %v1012_v32 = vpop.eup %1011  ;;  %v691_v33 = vmul.f32 1.442695, %v1447_v31 }
 0x26c   : > { %721 = vadd.xlane.f32.xlu1 %v1012_v32 }
 0x26d   : > { %1013 = vpow2.f32 %v691_v33 }
 0x270   : > { %v646_v34 = vpop.xlane.xlu2 %645 }
 0x271   : > { %v1451_v35 = vsub.f32 %v1397_v47, %v646_v34 }
 0x273   : > { %v1014_v37 = vpop.eup %1013  ;;  %v693_v38 = vmul.f32 1.442695, %v1451_v35 }
 0x274   : > { %723 = vadd.xlane.f32.xlu2 %v1014_v37 }
 0x275   : > { %1015 = vpow2.f32 %v693_v38 }
 0x27b   : > { %v1016_v39 = vpop.eup %1015 }
 0x27c   : > { %725 = vadd.xlane.f32.xlu0 %v1016_v39 }
 0x27e   : > { %v648_v40 = vpop.xlane.xlu0 %647 }
 0x27f   : > { %v1455_v41 = vsub.f32 %v1400_v36, %v648_v40 }
 0x281   : > { %v695_v42 = vmul.f32 1.442695, %v1455_v41 }
 0x283   : > { %1017 = vpow2.f32 %v695_v42 }
 0x286   : > { %v650_v43 = vpop.xlane.xlu1 %649 }
 0x287   : > { %v1459_v44 = vsub.f32 %v1403_v50, %v650_v43 }
 0x289   : > { %v1018_v45 = vpop.eup %1017  ;;  %v697_v46 = vmul.f32 1.442695, %v1459_v44 }
 0x28a   : > { %727 = vadd.xlane.f32.xlu1 %v1018_v45 }
 0x28b   : > { %1019 = vpow2.f32 %v697_v46 }
 0x28e   : > { %v652_v47 = vpop.xlane.xlu2 %651 }
 0x28f   : > { %v1463_v48 = vsub.f32 %v1406_v53, %v652_v47 }
 0x291   : > { %v1020_v49 = vpop.eup %1019  ;;  %v699_v36 = vmul.f32 1.442695, %v1463_v48 }
 0x292   : > { %729 = vadd.xlane.f32.xlu2 %v1020_v49 }
 0x293   : > { %1021 = vpow2.f32 %v699_v36 }
 0x296   : > { %v654_v51 = vpop.xlane.xlu0 %653 }
 0x297   : > { %v1467_v52 = vsub.f32 %v1412_v58, %v654_v51  ;;  %v704_v57 = vpop.xlane.xlu1 %703 }
 0x299   : > { %v1022_v50 = vpop.eup %1021  ;;  %v701_v55 = vmul.f32 1.442695, %v1467_v52 }
 0x29a   : > { %731 = vadd.xlane.f32.xlu0 %v1022_v50 }
 0x29b   : > { %1023 = vpow2.f32 %v701_v55 }
 0x29c   : > { %1025 = vlog2.f32 %v704_v57 }
 0x29f   : > { %v706_v53 = vpop.xlane.xlu2 %705 }
 0x2a0   : > { %1027 = vlog2.f32 %v706_v53 }
 0x2a1   : > { %v1024_v56 = vpop.eup %1023 }
 0x2a2   : > { %733 = vadd.xlane.f32.xlu1 %v1024_v56  ;;  %v1026_v60 = vpop.eup %1025 }
 0x2a3   : > { %v736_v61 = vmul.f32 0.6931472, %v1026_v60 }
 0x2a5   : > { %v767_v0 = vsub.f32 %v1408_v54, %v736_v61 }
 0x2a6   : > { %v1028_v1 = vpop.eup %1027 }
 0x2a7   : > { %v708_v62 = vpop.xlane.xlu0 %707  ;;  %v738_v58 = vmul.f32 0.6931472, %v1028_v1 }
 0x2a8   : > { %1029 = vlog2.f32 %v708_v62 }
 0x2a9   : > { %v768_v4 = vsub.f32 %v1414_v59, %v738_v58 }
 0x2ae   : > { %v1030_v5 = vpop.eup %1029 }
 0x2af   : > { %v710_v2 = vpop.xlane.xlu1 %709  ;;  %v740_v6 = vmul.f32 0.6931472, %v1030_v5 }
 0x2b0   : > { %1031 = vlog2.f32 %v710_v2 }
 0x2b1   : > { %v769_v9 = vsub.f32 %v1418_v63, %v740_v6 }
 0x2b6   : > { %v1032_v10 = vpop.eup %1031 }
 0x2b7   : > { %v712_v8 = vpop.xlane.xlu2 %711  ;;  %v742_v12 = vmul.f32 0.6931472, %v1032_v10 }
 0x2b8   : > { %1033 = vlog2.f32 %v712_v8 }
 0x2b9   : > { %v770_v54 = vsub.f32 %v1421_v3, %v742_v12 }
 0x2bb   : > { %783 = vxpose.xlu2.b32.start [1/16] (narrow) %v767_v0, 8 }
 0x2be   : > { %v1034_v14 = vpop.eup %1033 }
 0x2bf   : > { %v714_v13 = vpop.xlane.xlu0 %713  ;;  %v744_v16 = vmul.f32 0.6931472, %v1034_v14 }
 0x2c0   : > { %1035 = vlog2.f32 %v714_v13 }
 0x2c1   : > { %v771_v59 = vsub.f32 %v1424_v7, %v744_v16 }
 0x2c3   : > { %784 = vxpose.xlu2.b32.cont [2/16] (narrow) %v768_v4, 8 }
 0x2c6   : > { %v1036_v18 = vpop.eup %1035 }
 0x2c7   : > { %v716_v17 = vpop.xlane.xlu1 %715  ;;  %v746_v20 = vmul.f32 0.6931472, %v1036_v18 }
 0x2c8   : > { %1037 = vlog2.f32 %v716_v17 }
 0x2c9   : > { %v772_v63 = vsub.f32 %v1427_v11, %v746_v20 }
 0x2cb   : > { %785 = vxpose.xlu2.b32.cont [3/16] (narrow) %v769_v9, 8 }
 0x2ce   : > { %v1038_v22 = vpop.eup %1037 }
 0x2cf   : > { %v718_v21 = vpop.xlane.xlu2 %717  ;;  %v748_v24 = vmul.f32 0.6931472, %v1038_v22 }
 0x2d0   : > { %1039 = vlog2.f32 %v718_v21 }
 0x2d1   : > { %v773_v3 = vsub.f32 %v1431_v15, %v748_v24 }
 0x2d3   : > { %786 = vxpose.xlu2.b32.cont [4/16] (narrow) %v770_v54, 8 }
 0x2d6   : > { %v1040_v26 = vpop.eup %1039 }
 0x2d7   : > { %v720_v25 = vpop.xlane.xlu0 %719  ;;  %v750_v28 = vmul.f32 0.6931472, %v1040_v26 }
 0x2d8   : > { %1041 = vlog2.f32 %v720_v25 }
 0x2d9   : > { %v774_v7 = vsub.f32 %v1435_v19, %v750_v28 }
 0x2db   : > { %787 = vxpose.xlu2.b32.cont [5/16] (narrow) %v771_v59, 8 }
 0x2de   : > { %v1042_v30 = vpop.eup %1041 }
 0x2df   : > { %v722_v29 = vpop.xlane.xlu1 %721  ;;  %v752_v32 = vmul.f32 0.6931472, %v1042_v30 }
 0x2e0   : > { %1043 = vlog2.f32 %v722_v29 }
 0x2e1   : > { %v775_v11 = vsub.f32 %v1439_v23, %v752_v32 }
 0x2e3   : > { %788 = vxpose.xlu2.b32.cont [6/16] (narrow) %v772_v63, 8 }
 0x2e6   : > { %v1044_v34 = vpop.eup %1043 }
 0x2e7   : > { %v724_v33 = vpop.xlane.xlu2 %723  ;;  %v754_v37 = vmul.f32 0.6931472, %v1044_v34 }
 0x2e8   : > { %1045 = vlog2.f32 %v724_v33 }
 0x2e9   : > { %v776_v15 = vsub.f32 %v1443_v27, %v754_v37 }
 0x2eb   : > { %789 = vxpose.xlu2.b32.cont [7/16] (narrow) %v773_v3, 8 }
 0x2ee   : > { %v1046_v39 = vpop.eup %1045 }
 0x2ef   : > { %v726_v38 = vpop.xlane.xlu0 %725  ;;  %v756_v40 = vmul.f32 0.6931472, %v1046_v39 }
 0x2f0   : > { %1047 = vlog2.f32 %v726_v38 }
 0x2f1   : > { %v777_v19 = vsub.f32 %v1447_v31, %v756_v40 }
 0x2f3   : > { %790 = vxpose.xlu2.b32.cont [8/16] (narrow) %v774_v7, 8 }
 0x2f6   : > { %v1048_v43 = vpop.eup %1047 }
 0x2f7   : > { %v758_v45 = vmul.f32 0.6931472, %v1048_v43 }
 0x2f9   : > { %v778_v23 = vsub.f32 %v1451_v35, %v758_v45 }
 0x2fb   : > { %791 = vxpose.xlu2.b32.cont [9/16] (narrow) %v775_v11, 8 }
 0x2fd   : > { %v728_v42 = vpop.xlane.xlu1 %727 }
 0x2fe   : > { %1049 = vlog2.f32 %v728_v42 }
 0x303   : > { %792 = vxpose.xlu2.b32.cont [10/16] (narrow) %v776_v15, 8 }
 0x304   : > { %v1050_v47 = vpop.eup %1049 }
 0x305   : > { %v730_v46 = vpop.xlane.xlu2 %729  ;;  %v760_v49 = vmul.f32 0.6931472, %v1050_v47 }
 0x306   : > { %1051 = vlog2.f32 %v730_v46 }
 0x307   : > { %v779_v27 = vsub.f32 %v1455_v41, %v760_v49 }
 0x30b   : > { %793 = vxpose.xlu2.b32.cont [11/16] (narrow) %v777_v19, 8 }
 0x30c   : > { %v1052_v51 = vpop.eup %1051 }
 0x30d   : > { %v732_v36 = vpop.xlane.xlu0 %731  ;;  %v762_v31 = vmul.f32 0.6931472, %v1052_v51 }
 0x30e   : > { %1053 = vlog2.f32 %v732_v36 }
 0x30f   : > { %v780_v55 = vsub.f32 %v1459_v44, %v762_v31 }
 0x313   : > { %794 = vxpose.xlu2.b32.cont [12/16] (narrow) %v778_v23, 8 }
 0x314   : > { %v1054_v56 = vpop.eup %1053 }
 0x315   : > { %v734_v50 = vpop.xlane.xlu1 %733  ;;  %v764_v35 = vmul.f32 0.6931472, %v1054_v56 }
 0x316   : > { %1055 = vlog2.f32 %v734_v50 }
 0x317   : > { %v781_v57 = vsub.f32 %v1463_v48, %v764_v35 }
 0x31b   : > { %795 = vxpose.xlu2.b32.cont [13/16] (narrow) %v779_v27, 8 }
 0x31c   : > { %v1056_v53 = vpop.eup %1055 }
 0x31d   : > { %v766_v60 = vmul.f32 0.6931472, %v1056_v53 }
 0x31f   : > { %v782_v41 = vsub.f32 %v1467_v52, %v766_v60 }
 0x323   : > { %796 = vxpose.xlu2.b32.cont [14/16] (narrow) %v780_v55, 8 }
 0x32b   : > { %797 = vxpose.xlu2.b32.cont [15/16] (narrow) %v781_v57, 8 }
 0x333   : > { %798 = vxpose.xlu2.b32.end [16/16] (narrow) %v782_v41, 8 }
 0x354   : > { %v799_v44 = vpop.trf.xlu2 }
 0x355   : > { %815 = vst [vmem:[%s272_s8] sm:$0xff] %v799_v44 }
 0x356   : > { %1084 = shalt.err (!%p1081_p3)
}
 0x357   : > { %951 = dma.vmem_to_hbm [thread:$0]  (%p1199_p5), %s830_s20, 128, %s832_s21, %s817_s22  }
 0x358 PF: > { %p957_p4 = scmp.ge.s32.totalorder %s1119_s27, 2  ;;  %s843_s14 = sand.u32 1, %s1107_s24  }
 0x359   : > { %s844_s17 = scalar_lea.sflag [#allocation3], %s843_s14 }
 0x35a   : > { %p954_p7 = pnand %p957_p4, %p1203_p6 }
 0x35c   : > { %p955_p8 = pneg %p954_p7 }
 0x35e   : > { %1102 = dma.done.wait (%p955_p8), %s844_s17, 128  }
 0x35f   : > { %1104 = vsyncadd (%p955_p8), %s844_s17, 4294967168  ;;  %p17_p9 = scmp.ge.s32.totalorder %s1186_s30, 5   ;;  %s1528_s24 = smov %s1111_s25 }
 0x360   : > { %s1529_s25 = smov %s1115_s26  ;;  %s1530_s26 = smov %s1197_s10 }
 0x361   : > { %s1531_s27 = smov %s1186_s30  ;;  %19 = sbr.rel (!%p17_p9) target bundleno = 3 (0x3), region = 83 }
 0x366   :  { %850 = vsyncpa [#allocation3], 1 }
 0x367   :  { %852 = vsyncpa [#allocation3 + $0x1], 1 }

// kernel: tpu_custom_call.1
= control target key start
LH: loop header
LB: loop body
LE: loop exit
PB: predicated region body
PF: predicated region fallthrough
CT: control target
= control target key end

     0   :  { %12 = vsyncpa [#allocation3], 0  ;;  %s1518_s0 = inlined_call_operand.vmem [shape: f32[384,30], index: 0, kind: input, shape index: {}]   ;;  %s1519_s1 = inlined_call_operand.vmem [shape: f32[30,128], index: 1, kind: input, shape index: {}]   ;;  %s1520_s2 = inlined_call_operand.vmem [shape: f32[1,128], index: 2, kind: input, shape index: {}]   ;;  %s1521_s3 = inlined_call_operand.vmem [shape: f32[128,128], index: 3, kind: input, shape index: {}]   ;;  %s1522_s4 = inlined_call_operand.vmem [shape: f32[1,128], index: 4, kind: input, shape index: {}]   ;;  %s1523_s5 = inlined_call_operand.vmem [shape: f32[128,128], index: 5, kind: input, shape index: {}]   ;;  %s1524_s6 = inlined_call_operand.vmem [shape: f32[1,128], index: 6, kind: input, shape index: {}]   ;;  %s1525_s7 = inlined_call_operand.hbm [shape: f32[8,384], index: 7, kind: output, shape index: {}]  }
   0x1   :  { %14 = vsyncpa [#allocation3 + $0x1], 0  ;;  %s1161_s24 = smov 0   ;;  %s1163_s25 = smov 0  }
   0x2   :  { %s1165_s26 = smov 0   ;;  %s1167_s27 = smov 0  }
   0x3 LB: > { %s1182_s28 = sadd.s32 4294967295, %s1119_s27   ;;  %s891_s29 = sadd.s32 4294967294, %s1119_s27   ;;  %s1119_s27 = sphi %s1167_s27, %s1531_s27   ;;  %s1115_s26 = sphi %s1165_s26, %s1530_s26   ;;  %s1111_s25 = sphi %s1163_s25, %s1529_s25   ;;  %s1107_s24 = sphi %s1161_s24, %s1528_s24  }
   0x4   : > { %s1186_s30 = sadd.s32 1, %s1119_s27   ;;  %s179_s8 = sadd.s32 1, %s1115_s26 }
   0x5   : > { %s176_s9 = ssub.s32 %s1119_s27, %s1186_s30  ;;  %p189_p0 = scmp.ne.s32.totalorder %s1115_s26, %s1111_s25 }
   0x6   : > { %p177_p1 = scmp.eq.s32.totalorder %s176_s9, 0  ;;  %p190_p2 = scmp.eq.s32.totalorder %s1182_s28, 2 }
   0x7   : > { %p195_p3 = scmp.ne.s32.totalorder %s1111_s25, %s1107_s24  ;;  %p196_p4 = scmp.eq.s32.totalorder %s891_s29, 2 }
   0x8   : > { %s1197_s10 = scalar_select %p177_p1, %s1115_s26, %s179_s8  }
   0x9   : > { %p1199_p5 = por %p190_p2, %p189_p0  ;;  %p1203_p6 = por %p196_p4, %p195_p3 }
   0xa   : > { %p894_p7 = scmp.ge.s32.totalorder %s1119_s27, 1  ;;  %p241_p8 = scmp.lt.s32.totalorder %s1119_s27, 4 }
   0xc   : > { %p242_p9 = pnand %p894_p7, %p241_p8 }
   0xd   : > { %s896_s17 = sshll.u32 (!%p242_p9), %s1182_s28, 4  ;;  %s270_s14 = sand.u32 (!%p242_p9), 1, %s1111_s25  }
   0xe   : > { %245 = sbr.rel (%p242_p9) target bundleno = 856 (0x358), region = 48  ;;  %p274_p10 = scmp.lt.s32.totalorder (!%p242_p9), %s896_s17, 47 }
   0xf   : > { %s895_s15 = sshll.u32 (!%p242_p9), %s270_s14, 3  ;;  %s916_s16 = sshll.u32 (!%p242_p9), %s1182_s28, 3 }
  0x10   : > { %s827_s19 = scalar_lea.hbm (!%p242_p9), %s1525_s7, %s916_s16  ;;  %s1077_s13 = scalar_lea.hbm (!%p242_p9), %s1525_s7, 24 }
  0x11   : > { %s831_s21 = sshll.u32 (!%p242_p9), %s827_s19, 4  ;;  %s832_s21 = int_to_ptr.hbm [resolvable:$true] %s831_s21 }
  0x12   : > { %s1071_s23 = sshra.s32 (!%p242_p9), %s832_s21, 4  ;;  %s1072_s23 = int_to_ptr.hbm [resolvable:$true] %s1071_s23 }
  0x13   : > { %v298_v0 = vld [vmem:[%s1519_s1 + $0x18] sm:$0x3f]  ;;  %vm352_vm0 = vcmask 1045504   ;;  %v297_v1 = vld [vmem:[%s1519_s1 + $0x10] sm:$0xff]  ;;  %v296_v2 = vld [vmem:[%s1519_s1 + $0x8] sm:$0xff]  ;;  %s1533_s17 = smov (!%p274_p10, %s896_s17), 47  ;;  %p1078_p0 = scmp.lt.s32.totalorder %s1072_s23, %s1525_s7 }
  0x14   : > { %898 = vmatpush.msk.msra.mxu0 %vm352_vm0, %v298_v0  ;;  %v295_v3 = vld [vmem:[%s1519_s1] sm:$0xff]  ;;  %s897_s22 = sshll.u32 %s1533_s17, 3  ;;  %vm303_vm1 = vcmask 244736   ;;  %v452_v13 = vld [vmem:[%s1521_s3 + $0x78] sm:$0xff]  ;;  %v451_v14 = vld [vmem:[%s1521_s3 + $0x70] sm:$0xff]  ;;  %s1073_s29 = scalar_lea.hbm %s1072_s23, 8 }
  0x15   : > { %s1225_s8 = scalar_lea.vmem %s1518_s0, %s897_s22  ;;  %457 = vmatpush.msra.mxu1 %v452_v13  ;;  %919 = vmatpush.msra.mxu3 %v452_v13  ;;  %v450_v15 = vld [vmem:[%s1521_s3 + $0x68] sm:$0xff]  ;;  %v449_v17 = vld [vmem:[%s1521_s3 + $0x60] sm:$0xff]  ;;  %v448_v18 = vld [vmem:[%s1521_s3 + $0x58] sm:$0xff]  ;;  %s817_s22 = scalar_lea.sflag [#allocation3], %s270_s14 }
  0x16   : > { %369 = vmatpush.msra.mxu0 %v297_v1  ;;  %v279_v4 = vld [vmem:[%s1225_s8] sm:$0xff]  ;;  %v280_v5 = vld [vmem:[%s1225_s8 + $0x8] sm:$0xff]  ;;  %v281_v6 = vld [vmem:[%s1225_s8 + $0x10] sm:$0xff]  ;;  %p1074_p11 = scmp.ne.s32.totalorder %s1072_s23, %s1073_s29  ;;  %p1079_p1 = scmp.lt.s32.totalorder %s1077_s13, %s1073_s29 }
  0x17   : > { %v282_v7 = vld [vmem:[%s1225_s8 + $0x18] sm:$0xff]  ;;  %v283_v8 = vld [vmem:[%s1225_s8 + $0x20] sm:$0xff]  ;;  %v284_v9 = vld [vmem:[%s1225_s8 + $0x28] sm:$0xff]  ;;  %458 = vmatpush.msra.mxu1 %v451_v14  ;;  %920 = vmatpush.msra.mxu3 %v451_v14 }
  0x18   : > { %370 = vmatpush.msra.mxu0 %v296_v2  ;;  %v285_v10 = vld [vmem:[%s1225_s8 + $0x30] sm:$0xff]  ;;  %v286_v11 = vld [vmem:[%s1225_s8 + $0x38] sm:$0xff]  ;;  %v287_v12 = vld [vmem:[%s1225_s8 + $0x40] sm:$0xff]  ;;  %p1075_p12 = pnand %p1074_p11, %p1199_p5  ;;  %p1080_p2 = por %p1079_p1, %p1078_p0 }
  0x19   : > { %v288_v16 = vld [vmem:[%s1225_s8 + $0x48] sm:$0xff]  ;;  %459 = vmatpush.msra.mxu1 %v450_v15  ;;  %921 = vmatpush.msra.mxu3 %v450_v15  ;;  %v447_v19 = vld [vmem:[%s1521_s3 + $0x50] sm:$0xff]  ;;  %v445_v22 = vld [vmem:[%s1521_s3 + $0x40] sm:$0xff] }
  0x1a   : > { %371 = vmatpush.msra.mxu0 %v295_v3  ;;  %v446_v20 = vld [vmem:[%s1521_s3 + $0x48] sm:$0xff]  ;;  %v289_v21 = vld [vmem:[%s1225_s8 + $0x50] sm:$0xff]  ;;  %v444_v23 = vld [vmem:[%s1521_s3 + $0x38] sm:$0xff]  ;;  %p1076_p13 = pneg %p1075_p12 }
  0x1b   : > { %899 = vmatmul.msk.f32.vlgmr.msra.gmra.mxu0 %vm303_vm1, %v279_v4  ;;  %460 = vmatpush.msra.mxu1 %v449_v17  ;;  %v443_v24 = vld [vmem:[%s1521_s3 + $0x30] sm:$0xff]  ;;  %v442_v25 = vld [vmem:[%s1521_s3 + $0x28] sm:$0xff]  ;;  %v290_v26 = vld [vmem:[%s1225_s8 + $0x58] sm:$0xff] }
  0x1c   : > { %922 = vmatpush.msra.mxu3 %v449_v17  ;;  %v441_v27 = vld [vmem:[%s1521_s3 + $0x20] sm:$0xff]  ;;  %v440_v28 = vld [vmem:[%s1521_s3 + $0x18] sm:$0xff]  ;;  %v439_v29 = vld [vmem:[%s1521_s3 + $0x10] sm:$0xff]  ;;  %p1081_p3 = pnand %p1080_p2, %p1076_p13 }
  0x1d   : > { %461 = vmatpush.msra.mxu1 %v448_v18  ;;  %v291_v30 = vld [vmem:[%s1225_s8 + $0x60] sm:$0xff]  ;;  %v438_v31 = vld [vmem:[%s1521_s3 + $0x8] sm:$0xff]  ;;  %v293_v34 = vld [vmem:[%s1225_s8 + $0x70] sm:$0xff] }
  0x1e   : > { %923 = vmatpush.msra.mxu3 %v448_v18  ;;  %v437_v32 = vld [vmem:[%s1521_s3] sm:$0xff]  ;;  %v292_v33 = vld [vmem:[%s1225_s8 + $0x68] sm:$0xff]  ;;  %v294_v35 = vld [vmem:[%s1225_s8 + $0x78] sm:$0xff]  ;;  %s272_s8 = scalar_lea.vmem [#allocation2], %s895_s15 }
  0x1f   : > { %462 = vmatpush.msra.mxu1 %v447_v19  ;;  %v1310_v36 = vld [vmem:[%s1520_s2] ss:$0 sm:$0xff]  ;;  %v553_v0 = vld [vmem:[%s1523_s5 + $0x78] sm:$0xff]  ;;  %v552_v3 = vld [vmem:[%s1523_s5 + $0x70] sm:$0xff]  ;;  %s829_s20 = sshll.u32 %s272_s8, 4  ;;  %s830_s20 = int_to_ptr.vmem [resolvable:$true] %s829_s20 }
  0x20   : > { %924 = vmatpush.msra.mxu3 %v447_v19  ;;  %558 = vmatpush.msra.mxu2 %v553_v0  ;;  %v546_v13 = vld [vmem:[%s1523_s5 + $0x40] sm:$0xff]  ;;  %v545_v14 = vld [vmem:[%s1523_s5 + $0x38] sm:$0xff]  ;;  %v544_v17 = vld [vmem:[%s1523_s5 + $0x30] sm:$0xff] }
  0x21   : > { %463 = vmatpush.msra.mxu1 %v446_v20  ;;  %v543_v19 = vld [vmem:[%s1523_s5 + $0x28] sm:$0xff] }
  0x22   : > { %925 = vmatpush.msra.mxu3 %v446_v20  ;;  %559 = vmatpush.msra.mxu2 %v552_v3  ;;  %v542_v20 = vld [vmem:[%s1523_s5 + $0x20] sm:$0xff] }
  0x23   : > { %900 = vmatmul.msk.f32.gmra.mxu0 %vm303_vm1, %v280_v5  ;;  %464 = vmatpush.msra.mxu1 %v445_v22  ;;  %v551_v5 = vld [vmem:[%s1523_s5 + $0x68] sm:$0xff] }
  0x24   : > { %926 = vmatpush.msra.mxu3 %v445_v22  ;;  %560 = vmatpush.msra.mxu2 %v551_v5 }
  0x25   : > { %465 = vmatpush.msra.mxu1 %v444_v23 }
  0x26   : > { %927 = vmatpush.msra.mxu3 %v444_v23 }
  0x27   : > { %466 = vmatpush.msra.mxu1 %v443_v24 }
  0x28   : > { %928 = vmatpush.msra.mxu3 %v443_v24  ;;  %v540_v24 = vld [vmem:[%s1523_s5 + $0x10] sm:$0xff] }
  0x29   : > { %467 = vmatpush.msra.mxu1 %v442_v25 }
  0x2a   : > { %929 = vmatpush.msra.mxu3 %v442_v25 }
  0x2b   : > { %901 = vmatmul.msk.f32.gmra.mxu0 %vm303_vm1, %v281_v6  ;;  %468 = vmatpush.msra.mxu1 %v441_v27  ;;  %v550_v6 = vld [vmem:[%s1523_s5 + $0x60] sm:$0xff] }
  0x2c   : > { %930 = vmatpush.msra.mxu3 %v441_v27  ;;  %561 = vmatpush.msra.mxu2 %v550_v6  ;;  %v538_v27 = vld [vmem:[%s1523_s5] sm:$0xff] }
  0x2d   : > { %469 = vmatpush.msra.mxu1 %v440_v28 }
  0x2e   : > { %931 = vmatpush.msra.mxu3 %v440_v28 }
  0x2f   : > { %470 = vmatpush.msra.mxu1 %v439_v29 }
  0x30   : > { %932 = vmatpush.msra.mxu3 %v439_v29 }
  0x31   : > { %471 = vmatpush.msra.mxu1 %v438_v31 }
  0x32   : > { %933 = vmatpush.msra.mxu3 %v438_v31 }
  0x33   : > { %902 = vmatmul.msk.f32.gmra.mxu0 %vm303_vm1, %v282_v7  ;;  %472 = vmatpush.msra.mxu1 %v437_v32  ;;  %v549_v7 = vld [vmem:[%s1523_s5 + $0x58] sm:$0xff] }
  0x34   : > { %934 = vmatpush.msra.mxu3 %v437_v32  ;;  %562 = vmatpush.msra.mxu2 %v549_v7 }
  0x36   : > { %935 = vmatpush.msrb.mxu3 %v553_v0 }
  0x38   : > { %936 = vmatpush.msrb.mxu3 %v552_v3 }
  0x3a   : > { %937 = vmatpush.msrb.mxu3 %v551_v5 }
  0x3b   : > { %903 = vmatmul.msk.f32.gmra.mxu0 %vm303_vm1, %v283_v8 }
  0x3c   : > { %938 = vmatpush.msrb.mxu3 %v550_v6 }
  0x3e   : > { %939 = vmatpush.msrb.mxu3 %v549_v7 }
  0x43   : > { %904 = vmatmul.msk.f32.gmra.mxu0 %vm303_vm1, %v284_v9 }
  0x4b   : > { %905 = vmatmul.msk.f32.gmra.mxu0 %vm303_vm1, %v285_v10  ;;  %v548_v10 = vld [vmem:[%s1523_s5 + $0x50] sm:$0xff] }
  0x4c   : > { %563 = vmatpush.msra.mxu2 %v548_v10  ;;  %940 = vmatpush.msrb.mxu3 %v548_v10 }
  0x53   : > { %906 = vmatmul.msk.f32.gmra.mxu0 %vm303_vm1, %v286_v11 }
  0x5b   : > { %907 = vmatmul.msk.f32.gmra.mxu0 %vm303_vm1, %v287_v12  ;;  %v547_v12 = vld [vmem:[%s1523_s5 + $0x48] sm:$0xff] }
  0x5c   : > { %564 = vmatpush.msra.mxu2 %v547_v12  ;;  %941 = vmatpush.msrb.mxu3 %v547_v12 }
  0x5e   : > { %565 = vmatpush.msra.mxu2 %v546_v13  ;;  %942 = vmatpush.msrb.mxu3 %v546_v13 }
  0x60   : > { %566 = vmatpush.msra.mxu2 %v545_v14  ;;  %943 = vmatpush.msrb.mxu3 %v545_v14 }
  0x62   : > { %567 = vmatpush.msra.mxu2 %v544_v17  ;;  %944 = vmatpush.msrb.mxu3 %v544_v17 }
  0x63   : > { %908 = vmatmul.msk.f32.gmra.mxu0 %vm303_vm1, %v288_v16 }
  0x64   : > { %568 = vmatpush.msra.mxu2 %v543_v19  ;;  %945 = vmatpush.msrb.mxu3 %v543_v19 }
  0x66   : > { %569 = vmatpush.msra.mxu2 %v542_v20  ;;  %946 = vmatpush.msrb.mxu3 %v542_v20 }
  0x6b   : > { %909 = vmatmul.msk.f32.gmra.mxu0 %vm303_vm1, %v289_v21  ;;  %v541_v21 = vld [vmem:[%s1523_s5 + $0x18] sm:$0xff] }
  0x6c   : > { %570 = vmatpush.msra.mxu2 %v541_v21  ;;  %947 = vmatpush.msrb.mxu3 %v541_v21 }
  0x6e   : > { %571 = vmatpush.msra.mxu2 %v540_v24  ;;  %948 = vmatpush.msrb.mxu3 %v540_v24 }
  0x73   : > { %910 = vmatmul.msk.f32.gmra.mxu0 %vm303_vm1, %v290_v26  ;;  %v539_v26 = vld [vmem:[%s1523_s5 + $0x8] sm:$0xff] }
  0x74   : > { %572 = vmatpush.msra.mxu2 %v539_v26  ;;  %949 = vmatpush.msrb.mxu3 %v539_v26 }
  0x76   : > { %573 = vmatpush.msra.mxu2 %v538_v27  ;;  %950 = vmatpush.msrb.mxu3 %v538_v27 }
  0x7b   : > { %911 = vmatmul.msk.f32.gmra.mxu0 %vm303_vm1, %v291_v30 }
  0x83   : > { %912 = vmatmul.msk.f32.gmra.mxu0 %vm303_vm1, %v292_v33 }
  0x8b   : > { %913 = vmatmul.msk.f32.gmra.mxu0 %vm303_vm1, %v293_v34 }
  0x93   : > { %914 = vmatmul.msk.f32.gmra.mxu0 %vm303_vm1, %v294_v35 }
  0x98   : > { %v373_v37 = vpop.f32.mrf.mxu0 }
  0x99   : > { %v374_v38 = vadd.f32 %v1310_v36, %v373_v37 }
  0x9b   : > { %v421_v39 = vmax.f32 %v374_v38, 0.0  ;;  %v991_v38 = vld [vmem:[%s1522_s4] ss:$0 sm:$0xff] }
  0x9d   : > { %473 = vmatmul.f32.vlgmr.msra.gmra.mxu1 %v421_v39 }
  0xa0   : > { %v376_v40 = vpop.f32.mrf.mxu0 }
  0xa1   : > { %v377_v41 = vadd.f32 %v1310_v36, %v376_v40 }
  0xa3   : > { %v422_v42 = vmax.f32 %v377_v41, 0.0 }
  0xa5   : > { %476 = vmatmul.f32.gmra.mxu1 %v422_v42 }
  0xa8   : > { %v379_v43 = vpop.f32.mrf.mxu0 }
  0xa9   : > { %v380_v44 = vadd.f32 %v1310_v36, %v379_v43 }
  0xab   : > { %v423_v45 = vmax.f32 %v380_v44, 0.0 }
  0xad   : > { %479 = vmatmul.f32.gmra.mxu1 %v423_v45 }
  0xb0   : > { %v382_v46 = vpop.f32.mrf.mxu0 }
  0xb1   : > { %v383_v47 = vadd.f32 %v1310_v36, %v382_v46 }
  0xb3   : > { %v424_v48 = vmax.f32 %v383_v47, 0.0 }
  0xb5   : > { %482 = vmatmul.f32.gmra.mxu1 %v424_v48 }
  0xb8   : > { %v385_v49 = vpop.f32.mrf.mxu0 }
  0xb9   : > { %v386_v50 = vadd.f32 %v1310_v36, %v385_v49 }
  0xbb   : > { %v425_v51 = vmax.f32 %v386_v50, 0.0 }
  0xbd   : > { %485 = vmatmul.f32.gmra.mxu1 %v425_v51 }
  0xc0   : > { %v388_v52 = vpop.f32.mrf.mxu0 }
  0xc1   : > { %v389_v53 = vadd.f32 %v1310_v36, %v388_v52 }
  0xc3   : > { %v426_v54 = vmax.f32 %v389_v53, 0.0 }
  0xc5   : > { %488 = vmatmul.f32.gmra.mxu1 %v426_v54 }
  0xc8   : > { %v391_v55 = vpop.f32.mrf.mxu0 }
  0xc9   : > { %v392_v56 = vadd.f32 %v1310_v36, %v391_v55 }
  0xcb   : > { %v427_v57 = vmax.f32 %v392_v56, 0.0 }
  0xcd   : > { %491 = vmatmul.f32.gmra.mxu1 %v427_v57 }
  0xd0   : > { %v394_v58 = vpop.f32.mrf.mxu0 }
  0xd1   : > { %v395_v59 = vadd.f32 %v1310_v36, %v394_v58 }
  0xd3   : > { %v428_v60 = vmax.f32 %v395_v59, 0.0 }
  0xd5   : > { %494 = vmatmul.f32.gmra.mxu1 %v428_v60 }
  0xd8   : > { %v397_v61 = vpop.f32.mrf.mxu0 }
  0xd9   : > { %v398_v62 = vadd.f32 %v1310_v36, %v397_v61 }
  0xdb   : > { %v429_v63 = vmax.f32 %v398_v62, 0.0 }
  0xdd   : > { %497 = vmatmul.f32.gmra.mxu1 %v429_v63 }
  0xe0   : > { %v400_v1 = vpop.f32.mrf.mxu0 }
  0xe1   : > { %v401_v2 = vadd.f32 %v1310_v36, %v400_v1 }
  0xe3   : > { %v430_v4 = vmax.f32 %v401_v2, 0.0 }
  0xe5   : > { %500 = vmatmul.f32.gmra.mxu1 %v430_v4 }
  0xe8   : > { %v403_v8 = vpop.f32.mrf.mxu0 }
  0xe9   : > { %v404_v9 = vadd.f32 %v1310_v36, %v403_v8 }
  0xeb   : > { %v431_v11 = vmax.f32 %v404_v9, 0.0 }
  0xed   : > { %503 = vmatmul.f32.gmra.mxu1 %v431_v11 }
  0xf0   : > { %v406_v15 = vpop.f32.mrf.mxu0 }
  0xf1   : > { %v407_v16 = vadd.f32 %v1310_v36, %v406_v15 }
  0xf3   : > { %v432_v18 = vmax.f32 %v407_v16, 0.0 }
  0xf5   : > { %506 = vmatmul.f32.gmra.mxu1 %v432_v18 }
  0xf8   : > { %v409_v22 = vpop.f32.mrf.mxu0 }
  0xf9   : > { %v410_v23 = vadd.f32 %v1310_v36, %v409_v22  ;;  %v992_v22 = vld [vmem:[%s1524_s6] ss:$0 sm:$0xff] }
  0xfb   : > { %v433_v25 = vmax.f32 %v410_v23, 0.0 }
  0xfd   : > { %509 = vmatmul.f32.vlgmr.msra.gmra.mxu3 %v433_v25 }
 0x100   : > { %v412_v28 = vpop.f32.mrf.mxu0 }
 0x101   : > { %v413_v29 = vadd.f32 %v1310_v36, %v412_v28 }
 0x103   : > { %v434_v30 = vmax.f32 %v413_v29, 0.0 }
 0x105   : > { %512 = vmatmul.f32.gmra.mxu3 %v434_v30 }
 0x108   : > { %v415_v31 = vpop.f32.mrf.mxu0 }
 0x109   : > { %v416_v32 = vadd.f32 %v1310_v36, %v415_v31 }
 0x10b   : > { %v435_v33 = vmax.f32 %v416_v32, 0.0 }
 0x10d   : > { %515 = vmatmul.f32.gmra.mxu3 %v435_v33 }
 0x110   : > { %v418_v34 = vpop.f32.mrf.mxu0 }
 0x111   : > { %v419_v35 = vadd.f32 %v1310_v36, %v418_v34 }
 0x113   : > { %v436_v37 = vmax.f32 %v419_v35, 0.0 }
 0x115   : > { %518 = vmatmul.f32.gmra.mxu3 %v436_v37 }
 0x11a   : > { %v474_v39 = vpop.f32.mrf.mxu1 }
 0x11b   : > { %v475_v40 = vadd.f32 %v991_v38, %v474_v39 }
 0x11d   : > { %v522_v41 = vmax.f32 %v475_v40, 0.0 }
 0x11f   : > { %574 = vmatmul.f32.vlgmr.msra.gmra.mxu2 %v522_v41 }
 0x122   : > { %v477_v42 = vpop.f32.mrf.mxu1 }
 0x123   : > { %v478_v43 = vadd.f32 %v991_v38, %v477_v42 }
 0x125   : > { %v523_v44 = vmax.f32 %v478_v43, 0.0 }
 0x127   : > { %577 = vmatmul.f32.gmra.mxu2 %v523_v44 }
 0x12a   : > { %v480_v45 = vpop.f32.mrf.mxu1 }
 0x12b   : > { %v481_v46 = vadd.f32 %v991_v38, %v480_v45 }
 0x12d   : > { %v524_v47 = vmax.f32 %v481_v46, 0.0 }
 0x12f   : > { %580 = vmatmul.f32.gmra.mxu2 %v524_v47 }
 0x132   : > { %v483_v48 = vpop.f32.mrf.mxu1 }
 0x133   : > { %v484_v36 = vadd.f32 %v991_v38, %v483_v48 }
 0x135   : > { %v525_v49 = vmax.f32 %v484_v36, 0.0 }
 0x137   : > { %583 = vmatmul.f32.gmra.mxu2 %v525_v49 }
 0x13a   : > { %v486_v50 = vpop.f32.mrf.mxu1 }
 0x13b   : > { %v487_v51 = vadd.f32 %v991_v38, %v486_v50 }
 0x13d   : > { %v526_v52 = vmax.f32 %v487_v51, 0.0 }
 0x13f   : > { %586 = vmatmul.f32.gmra.mxu2 %v526_v52 }
 0x142   : > { %v489_v53 = vpop.f32.mrf.mxu1 }
 0x143   : > { %v490_v54 = vadd.f32 %v991_v38, %v489_v53 }
 0x145   : > { %v527_v55 = vmax.f32 %v490_v54, 0.0 }
 0x147   : > { %589 = vmatmul.f32.gmra.mxu2 %v527_v55 }
 0x14a   : > { %v492_v56 = vpop.f32.mrf.mxu1 }
 0x14b   : > { %v493_v57 = vadd.f32 %v991_v38, %v492_v56 }
 0x14d   : > { %v528_v58 = vmax.f32 %v493_v57, 0.0 }
 0x14f   : > { %592 = vmatmul.f32.gmra.mxu2 %v528_v58 }
 0x152   : > { %v495_v59 = vpop.f32.mrf.mxu1 }
 0x153   : > { %v496_v60 = vadd.f32 %v991_v38, %v495_v59 }
 0x155   : > { %v529_v61 = vmax.f32 %v496_v60, 0.0 }
 0x157   : > { %595 = vmatmul.f32.gmra.mxu2 %v529_v61 }
 0x15a   : > { %v498_v62 = vpop.f32.mrf.mxu1 }
 0x15b   : > { %v499_v63 = vadd.f32 %v991_v38, %v498_v62 }
 0x15d   : > { %v530_v0 = vmax.f32 %v499_v63, 0.0 }
 0x15f   : > { %598 = vmatmul.f32.gmra.mxu2 %v530_v0 }
 0x162   : > { %v501_v1 = vpop.f32.mrf.mxu1 }
 0x163   : > { %v502_v2 = vadd.f32 %v991_v38, %v501_v1 }
 0x165   : > { %v531_v3 = vmax.f32 %v502_v2, 0.0 }
 0x167   : > { %601 = vmatmul.f32.gmra.mxu2 %v531_v3 }
 0x16a   : > { %v504_v4 = vpop.f32.mrf.mxu1 }
 0x16b   : > { %v505_v5 = vadd.f32 %v991_v38, %v504_v4 }
 0x16d   : > { %v532_v6 = vmax.f32 %v505_v5, 0.0 }
 0x16f   : > { %604 = vmatmul.f32.gmra.mxu2 %v532_v6 }
 0x172   : > { %v507_v7 = vpop.f32.mrf.mxu1 }
 0x173   : > { %v508_v8 = vadd.f32 %v991_v38, %v507_v7 }
 0x175   : > { %v533_v9 = vmax.f32 %v508_v8, 0.0 }
 0x177   : > { %607 = vmatmul.f32.gmra.mxu2 %v533_v9 }
 0x180   : > { %v510_v10 = vpop.f32.mrf.mxu3 }
 0x181   : > { %v511_v11 = vadd.f32 %v991_v38, %v510_v10 }
 0x183   : > { %v534_v12 = vmax.f32 %v511_v11, 0.0 }
 0x185   : > { %610 = vmatmul.f32.vlgmr.msrb.gmra.mxu3 %v534_v12 }
 0x188   : > { %v513_v13 = vpop.f32.mrf.mxu3 }
 0x189   : > { %v514_v14 = vadd.f32 %v991_v38, %v513_v13 }
 0x18b   : > { %v535_v15 = vmax.f32 %v514_v14, 0.0 }
 0x18d   : > { %613 = vmatmul.f32.gmra.mxu3 %v535_v15 }
 0x190   : > { %v516_v16 = vpop.f32.mrf.mxu3 }
 0x191   : > { %v517_v17 = vadd.f32 %v991_v38, %v516_v16 }
 0x193   : > { %v536_v18 = vmax.f32 %v517_v17, 0.0 }
 0x195   : > { %616 = vmatmul.f32.gmra.mxu3 %v536_v18 }
 0x198   : > { %v519_v19 = vpop.f32.mrf.mxu3 }
 0x199   : > { %v520_v20 = vadd.f32 %v991_v38, %v519_v19 }
 0x19b   : > { %v537_v21 = vmax.f32 %v520_v20, 0.0 }
 0x19d   : > { %619 = vmatmul.f32.gmra.mxu3 %v537_v21 }
 0x1a2   : > { %v575_v23 = vpop.f32.mrf.mxu2 }
 0x1a3   : > { %v576_v24 = vadd.f32 %v992_v22, %v575_v23 }
 0x1a5   : > { %623 = vmax.xlane.f32.xlu0 %v576_v24 }
 0x1aa   : > { %v578_v25 = vpop.f32.mrf.mxu2 }
 0x1ab   : > { %v579_v26 = vadd.f32 %v992_v22, %v578_v25 }
 0x1ad   : > { %625 = vmax.xlane.f32.xlu0 %v579_v26 }
 0x1b2   : > { %v581_v27 = vpop.f32.mrf.mxu2 }
 0x1b3   : > { %v582_v28 = vadd.f32 %v992_v22, %v581_v27 }
 0x1b5   : > { %627 = vmax.xlane.f32.xlu1 %v582_v28 }
 0x1ba   : > { %v584_v29 = vpop.f32.mrf.mxu2 }
 0x1bb   : > { %v585_v30 = vadd.f32 %v992_v22, %v584_v29 }
 0x1bd   : > { %629 = vmax.xlane.f32.xlu1 %v585_v30 }
 0x1c2   : > { %v587_v31 = vpop.f32.mrf.mxu2 }
 0x1c3   : > { %v588_v32 = vadd.f32 %v992_v22, %v587_v31 }
 0x1c5   : > { %631 = vmax.xlane.f32.xlu2 %v588_v32 }
 0x1ca   : > { %v590_v33 = vpop.f32.mrf.mxu2 }
 0x1cb   : > { %v591_v34 = vadd.f32 %v992_v22, %v590_v33 }
 0x1cd   : > { %633 = vmax.xlane.f32.xlu2 %v591_v34 }
 0x1d2   : > { %v593_v35 = vpop.f32.mrf.mxu2 }
 0x1d3   : > { %v1382_v37 = vadd.f32 %v992_v22, %v593_v35 }
 0x1d5   : > { %635 = vmax.xlane.f32.xlu0 %v1382_v37 }
 0x1da   : > { %v596_v38 = vpop.f32.mrf.mxu2 }
 0x1db   : > { %v1385_v39 = vadd.f32 %v992_v22, %v596_v38 }
 0x1dd   : > { %637 = vmax.xlane.f32.xlu1 %v1385_v39 }
 0x1e2   : > { %v599_v40 = vpop.f32.mrf.mxu2 }
 0x1e3   : > { %v1388_v41 = vadd.f32 %v992_v22, %v599_v40 }
 0x1e5   : > { %639 = vmax.xlane.f32.xlu2 %v1388_v41 }
 0x1ea   : > { %v602_v42 = vpop.f32.mrf.mxu2 }
 0x1eb   : > { %v1391_v43 = vadd.f32 %v992_v22, %v602_v42 }
 0x1ed   : > { %641 = vmax.xlane.f32.xlu0 %v1391_v43 }
 0x1f2   : > { %v605_v44 = vpop.f32.mrf.mxu2 }
 0x1f3   : > { %v1394_v45 = vadd.f32 %v992_v22, %v605_v44 }
 0x1f5   : > { %643 = vmax.xlane.f32.xlu1 %v1394_v45 }
 0x1fa   : > { %v608_v46 = vpop.f32.mrf.mxu2 }
 0x1fb   : > { %v1397_v47 = vadd.f32 %v992_v22, %v608_v46 }
 0x1fd   : > { %645 = vmax.xlane.f32.xlu2 %v1397_v47 }
 0x208   : > { %v611_v48 = vpop.f32.mrf.mxu3 }
 0x209   : > { %v1400_v36 = vadd.f32 %v992_v22, %v611_v48 }
 0x20b   : > { %647 = vmax.xlane.f32.xlu0 %v1400_v36 }
 0x210   : > { %v614_v49 = vpop.f32.mrf.mxu3 }
 0x211   : > { %v1403_v50 = vadd.f32 %v992_v22, %v614_v49 }
 0x213   : > { %649 = vmax.xlane.f32.xlu1 %v1403_v50 }
 0x218   : > { %v617_v51 = vpop.f32.mrf.mxu3  ;;  %v624_v52 = vpop.xlane.xlu0 %623 }
 0x219   : > { %v1406_v53 = vadd.f32 %v992_v22, %v617_v51  ;;  %v1408_v54 = vsub.f32 %v576_v24, %v624_v52 }
 0x21b   : > { %v671_v55 = vmul.f32 1.442695, %v1408_v54  ;;  %651 = vmax.xlane.f32.xlu2 %v1406_v53 }
 0x21d   : > { %993 = vpow2.f32 %v671_v55 }
 0x220   : > { %v620_v56 = vpop.f32.mrf.mxu3  ;;  %v626_v57 = vpop.xlane.xlu0 %625 }
 0x221   : > { %v1412_v58 = vadd.f32 %v992_v22, %v620_v56  ;;  %v1414_v59 = vsub.f32 %v579_v26, %v626_v57 }
 0x223   : > { %v994_v60 = vpop.eup %993  ;;  %v673_v61 = vmul.f32 1.442695, %v1414_v59  ;;  %653 = vmax.xlane.f32.xlu0 %v1412_v58 }
 0x224   : > { %703 = vadd.xlane.f32.xlu1 %v994_v60 }
 0x225   : > { %995 = vpow2.f32 %v673_v61 }
 0x228   : > { %v628_v62 = vpop.xlane.xlu1 %627 }
 0x229   : > { %v1418_v63 = vsub.f32 %v582_v28, %v628_v62 }
 0x22b   : > { %v996_v0 = vpop.eup %995  ;;  %v675_v1 = vmul.f32 1.442695, %v1418_v63 }
 0x22c   : > { %705 = vadd.xlane.f32.xlu2 %v996_v0 }
 0x22d   : > { %997 = vpow2.f32 %v675_v1 }
 0x230   : > { %v630_v2 = vpop.xlane.xlu1 %629 }
 0x231   : > { %v1421_v3 = vsub.f32 %v585_v30, %v630_v2 }
 0x233   : > { %v998_v4 = vpop.eup %997  ;;  %v677_v5 = vmul.f32 1.442695, %v1421_v3 }
 0x234   : > { %707 = vadd.xlane.f32.xlu0 %v998_v4 }
 0x235   : > { %999 = vpow2.f32 %v677_v5 }
 0x238   : > { %v632_v6 = vpop.xlane.xlu2 %631 }
 0x239   : > { %v1424_v7 = vsub.f32 %v588_v32, %v632_v6 }
 0x23b   : > { %v1000_v8 = vpop.eup %999  ;;  %v679_v9 = vmul.f32 1.442695, %v1424_v7 }
 0x23c   : > { %709 = vadd.xlane.f32.xlu1 %v1000_v8 }
 0x23d   : > { %1001 = vpow2.f32 %v679_v9 }
 0x240   : > { %v634_v10 = vpop.xlane.xlu2 %633 }
 0x241   : > { %v1427_v11 = vsub.f32 %v591_v34, %v634_v10 }
 0x243   : > { %v1002_v12 = vpop.eup %1001  ;;  %v681_v13 = vmul.f32 1.442695, %v1427_v11 }
 0x244   : > { %711 = vadd.xlane.f32.xlu2 %v1002_v12 }
 0x245   : > { %1003 = vpow2.f32 %v681_v13 }
 0x248   : > { %v636_v14 = vpop.xlane.xlu0 %635 }
 0x249   : > { %v1431_v15 = vsub.f32 %v1382_v37, %v636_v14 }
 0x24b   : > { %v1004_v16 = vpop.eup %1003  ;;  %v683_v17 = vmul.f32 1.442695, %v1431_v15 }
 0x24c   : > { %713 = vadd.xlane.f32.xlu0 %v1004_v16 }
 0x24d   : > { %1005 = vpow2.f32 %v683_v17 }
 0x250   : > { %v638_v18 = vpop.xlane.xlu1 %637 }
 0x251   : > { %v1435_v19 = vsub.f32 %v1385_v39, %v638_v18 }
 0x253   : > { %v1006_v20 = vpop.eup %1005  ;;  %v685_v21 = vmul.f32 1.442695, %v1435_v19 }
 0x254   : > { %715 = vadd.xlane.f32.xlu1 %v1006_v20 }
 0x255   : > { %1007 = vpow2.f32 %v685_v21 }
 0x258   : > { %v640_v22 = vpop.xlane.xlu2 %639 }
 0x259   : > { %v1439_v23 = vsub.f32 %v1388_v41, %v640_v22 }
 0x25b   : > { %v1008_v24 = vpop.eup %1007  ;;  %v687_v25 = vmul.f32 1.442695, %v1439_v23 }
 0x25c   : > { %717 = vadd.xlane.f32.xlu2 %v1008_v24 }
 0x25d   : > { %1009 = vpow2.f32 %v687_v25 }
 0x260   : > { %v642_v26 = vpop.xlane.xlu0 %641 }
 0x261   : > { %v1443_v27 = vsub.f32 %v1391_v43, %v642_v26 }
 0x263   : > { %v1010_v28 = vpop.eup %1009  ;;  %v689_v29 = vmul.f32 1.442695, %v1443_v27 }
 0x264   : > { %719 = vadd.xlane.f32.xlu0 %v1010_v28 }
 0x265   : > { %1011 = vpow2.f32 %v689_v29 }
 0x268   : > { %v644_v30 = vpop.xlane.xlu1 %643 }
 0x269   : > { %v1447_v31 = vsub.f32 %v1394_v45, %v644_v30 }
 0x26b   : > { %v1012_v32 = vpop.eup %1011  ;;  %v691_v33 = vmul.f32 1.442695, %v1447_v31 }
 0x26c   : > { %721 = vadd.xlane.f32.xlu1 %v1012_v32 }
 0x26d   : > { %1013 = vpow2.f32 %v691_v33 }
 0x270   : > { %v646_v34 = vpop.xlane.xlu2 %645 }
 0x271   : > { %v1451_v35 = vsub.f32 %v1397_v47, %v646_v34 }
 0x273   : > { %v1014_v37 = vpop.eup %1013  ;;  %v693_v38 = vmul.f32 1.442695, %v1451_v35 }
 0x274   : > { %723 = vadd.xlane.f32.xlu2 %v1014_v37 }
 0x275   : > { %1015 = vpow2.f32 %v693_v38 }
 0x27b   : > { %v1016_v39 = vpop.eup %1015 }
 0x27c   : > { %725 = vadd.xlane.f32.xlu0 %v1016_v39 }
 0x27e   : > { %v648_v40 = vpop.xlane.xlu0 %647 }
 0x27f   : > { %v1455_v41 = vsub.f32 %v1400_v36, %v648_v40 }
 0x281   : > { %v695_v42 = vmul.f32 1.442695, %v1455_v41 }
 0x283   : > { %1017 = vpow2.f32 %v695_v42 }
 0x286   : > { %v650_v43 = vpop.xlane.xlu1 %649 }
 0x287   : > { %v1459_v44 = vsub.f32 %v1403_v50, %v650_v43 }
 0x289   : > { %v1018_v45 = vpop.eup %1017  ;;  %v697_v46 = vmul.f32 1.442695, %v1459_v44 }
 0x28a   : > { %727 = vadd.xlane.f32.xlu1 %v1018_v45 }
 0x28b   : > { %1019 = vpow2.f32 %v697_v46 }
 0x28e   : > { %v652_v47 = vpop.xlane.xlu2 %651 }
 0x28f   : > { %v1463_v48 = vsub.f32 %v1406_v53, %v652_v47 }
 0x291   : > { %v1020_v49 = vpop.eup %1019  ;;  %v699_v36 = vmul.f32 1.442695, %v1463_v48 }
 0x292   : > { %729 = vadd.xlane.f32.xlu2 %v1020_v49 }
 0x293   : > { %1021 = vpow2.f32 %v699_v36 }
 0x296   : > { %v654_v51 = vpop.xlane.xlu0 %653 }
 0x297   : > { %v1467_v52 = vsub.f32 %v1412_v58, %v654_v51  ;;  %v704_v57 = vpop.xlane.xlu1 %703 }
 0x299   : > { %v1022_v50 = vpop.eup %1021  ;;  %v701_v55 = vmul.f32 1.442695, %v1467_v52 }
 0x29a   : > { %731 = vadd.xlane.f32.xlu0 %v1022_v50 }
 0x29b   : > { %1023 = vpow2.f32 %v701_v55 }
 0x29c   : > { %1025 = vlog2.f32 %v704_v57 }
 0x29f   : > { %v706_v53 = vpop.xlane.xlu2 %705 }
 0x2a0   : > { %1027 = vlog2.f32 %v706_v53 }
 0x2a1   : > { %v1024_v56 = vpop.eup %1023 }
 0x2a2   : > { %733 = vadd.xlane.f32.xlu1 %v1024_v56  ;;  %v1026_v60 = vpop.eup %1025 }
 0x2a3   : > { %v736_v61 = vmul.f32 0.6931472, %v1026_v60 }
 0x2a5   : > { %v767_v0 = vsub.f32 %v1408_v54, %v736_v61 }
 0x2a6   : > { %v1028_v1 = vpop.eup %1027 }
 0x2a7   : > { %v708_v62 = vpop.xlane.xlu0 %707  ;;  %v738_v58 = vmul.f32 0.6931472, %v1028_v1 }
 0x2a8   : > { %1029 = vlog2.f32 %v708_v62 }
 0x2a9   : > { %v768_v4 = vsub.f32 %v1414_v59, %v738_v58 }
 0x2ae   : > { %v1030_v5 = vpop.eup %1029 }
 0x2af   : > { %v710_v2 = vpop.xlane.xlu1 %709  ;;  %v740_v6 = vmul.f32 0.6931472, %v1030_v5 }
 0x2b0   : > { %1031 = vlog2.f32 %v710_v2 }
 0x2b1   : > { %v769_v9 = vsub.f32 %v1418_v63, %v740_v6 }
 0x2b6   : > { %v1032_v10 = vpop.eup %1031 }
 0x2b7   : > { %v712_v8 = vpop.xlane.xlu2 %711  ;;  %v742_v12 = vmul.f32 0.6931472, %v1032_v10 }
 0x2b8   : > { %1033 = vlog2.f32 %v712_v8 }
 0x2b9   : > { %v770_v54 = vsub.f32 %v1421_v3, %v742_v12 }
 0x2bb   : > { %783 = vxpose.xlu2.b32.start [1/16] (narrow) %v767_v0, 8 }
 0x2be   : > { %v1034_v14 = vpop.eup %1033 }
 0x2bf   : > { %v714_v13 = vpop.xlane.xlu0 %713  ;;  %v744_v16 = vmul.f32 0.6931472, %v1034_v14 }
 0x2c0   : > { %1035 = vlog2.f32 %v714_v13 }
 0x2c1   : > { %v771_v59 = vsub.f32 %v1424_v7, %v744_v16 }
 0x2c3   : > { %784 = vxpose.xlu2.b32.cont [2/16] (narrow) %v768_v4, 8 }
 0x2c6   : > { %v1036_v18 = vpop.eup %1035 }
 0x2c7   : > { %v716_v17 = vpop.xlane.xlu1 %715  ;;  %v746_v20 = vmul.f32 0.6931472, %v1036_v18 }
 0x2c8   : > { %1037 = vlog2.f32 %v716_v17 }
 0x2c9   : > { %v772_v63 = vsub.f32 %v1427_v11, %v746_v20 }
 0x2cb   : > { %785 = vxpose.xlu2.b32.cont [3/16] (narrow) %v769_v9, 8 }
 0x2ce   : > { %v1038_v22 = vpop.eup %1037 }
 0x2cf   : > { %v718_v21 = vpop.xlane.xlu2 %717  ;;  %v748_v24 = vmul.f32 0.6931472, %v1038_v22 }
 0x2d0   : > { %1039 = vlog2.f32 %v718_v21 }
 0x2d1   : > { %v773_v3 = vsub.f32 %v1431_v15, %v748_v24 }
 0x2d3   : > { %786 = vxpose.xlu2.b32.cont [4/16] (narrow) %v770_v54, 8 }
 0x2d6   : > { %v1040_v26 = vpop.eup %1039 }
 0x2d7   : > { %v720_v25 = vpop.xlane.xlu0 %719  ;;  %v750_v28 = vmul.f32 0.6931472, %v1040_v26 }
 0x2d8   : > { %1041 = vlog2.f32 %v720_v25 }
 0x2d9   : > { %v774_v7 = vsub.f32 %v1435_v19, %v750_v28 }
 0x2db   : > { %787 = vxpose.xlu2.b32.cont [5/16] (narrow) %v771_v59, 8 }
 0x2de   : > { %v1042_v30 = vpop.eup %1041 }
 0x2df   : > { %v722_v29 = vpop.xlane.xlu1 %721  ;;  %v752_v32 = vmul.f32 0.6931472, %v1042_v30 }
 0x2e0   : > { %1043 = vlog2.f32 %v722_v29 }
 0x2e1   : > { %v775_v11 = vsub.f32 %v1439_v23, %v752_v32 }
 0x2e3   : > { %788 = vxpose.xlu2.b32.cont [6/16] (narrow) %v772_v63, 8 }
 0x2e6   : > { %v1044_v34 = vpop.eup %1043 }
 0x2e7   : > { %v724_v33 = vpop.xlane.xlu2 %723  ;;  %v754_v37 = vmul.f32 0.6931472, %v1044_v34 }
 0x2e8   : > { %1045 = vlog2.f32 %v724_v33 }
 0x2e9   : > { %v776_v15 = vsub.f32 %v1443_v27, %v754_v37 }
 0x2eb   : > { %789 = vxpose.xlu2.b32.cont [7/16] (narrow) %v773_v3, 8 }
 0x2ee   : > { %v1046_v39 = vpop.eup %1045 }
 0x2ef   : > { %v726_v38 = vpop.xlane.xlu0 %725  ;;  %v756_v40 = vmul.f32 0.6931472, %v1046_v39 }
 0x2f0   : > { %1047 = vlog2.f32 %v726_v38 }
 0x2f1   : > { %v777_v19 = vsub.f32 %v1447_v31, %v756_v40 }
 0x2f3   : > { %790 = vxpose.xlu2.b32.cont [8/16] (narrow) %v774_v7, 8 }
 0x2f6   : > { %v1048_v43 = vpop.eup %1047 }
 0x2f7   : > { %v758_v45 = vmul.f32 0.6931472, %v1048_v43 }
 0x2f9   : > { %v778_v23 = vsub.f32 %v1451_v35, %v758_v45 }
 0x2fb   : > { %791 = vxpose.xlu2.b32.cont [9/16] (narrow) %v775_v11, 8 }
 0x2fd   : > { %v728_v42 = vpop.xlane.xlu1 %727 }
 0x2fe   : > { %1049 = vlog2.f32 %v728_v42 }
 0x303   : > { %792 = vxpose.xlu2.b32.cont [10/16] (narrow) %v776_v15, 8 }
 0x304   : > { %v1050_v47 = vpop.eup %1049 }
 0x305   : > { %v730_v46 = vpop.xlane.xlu2 %729  ;;  %v760_v49 = vmul.f32 0.6931472, %v1050_v47 }
 0x306   : > { %1051 = vlog2.f32 %v730_v46 }
 0x307   : > { %v779_v27 = vsub.f32 %v1455_v41, %v760_v49 }
 0x30b   : > { %793 = vxpose.xlu2.b32.cont [11/16] (narrow) %v777_v19, 8 }
 0x30c   : > { %v1052_v51 = vpop.eup %1051 }
 0x30d   : > { %v732_v36 = vpop.xlane.xlu0 %731  ;;  %v762_v31 = vmul.f32 0.6931472, %v1052_v51 }
 0x30e   : > { %1053 = vlog2.f32 %v732_v36 }
 0x30f   : > { %v780_v55 = vsub.f32 %v1459_v44, %v762_v31 }
 0x313   : > { %794 = vxpose.xlu2.b32.cont [12/16] (narrow) %v778_v23, 8 }
 0x314   : > { %v1054_v56 = vpop.eup %1053 }
 0x315   : > { %v734_v50 = vpop.xlane.xlu1 %733  ;;  %v764_v35 = vmul.f32 0.6931472, %v1054_v56 }
 0x316   : > { %1055 = vlog2.f32 %v734_v50 }
 0x317   : > { %v781_v57 = vsub.f32 %v1463_v48, %v764_v35 }
 0x31b   : > { %795 = vxpose.xlu2.b32.cont [13/16] (narrow) %v779_v27, 8 }
 0x31c   : > { %v1056_v53 = vpop.eup %1055 }
 0x31d   : > { %v766_v60 = vmul.f32 0.6931472, %v1056_v53 }
 0x31f   : > { %v782_v41 = vsub.f32 %v1467_v52, %v766_v60 }
 0x323   : > { %796 = vxpose.xlu2.b32.cont [14/16] (narrow) %v780_v55, 8 }
 0x32b   : > { %797 = vxpose.xlu2.b32.cont [15/16] (narrow) %v781_v57, 8 }
 0x333   : > { %798 = vxpose.xlu2.b32.end [16/16] (narrow) %v782_v41, 8 }
 0x354   : > { %v799_v44 = vpop.trf.xlu2 }
 0x355   : > { %815 = vst [vmem:[%s272_s8] sm:$0xff] %v799_v44 }
 0x356   : > { %1084 = shalt.err (!%p1081_p3)
}
 0x357   : > { %951 = dma.vmem_to_hbm [thread:$0]  (%p1199_p5), %s830_s20, 128, %s832_s21, %s817_s22  }
 0x358 PF: > { %p957_p4 = scmp.ge.s32.totalorder %s1119_s27, 2  ;;  %s843_s14 = sand.u32 1, %s1107_s24  }
 0x359   : > { %s844_s17 = scalar_lea.sflag [#allocation3], %s843_s14 }
 0x35a   : > { %p954_p7 = pnand %p957_p4, %p1203_p6 }
 0x35c   : > { %p955_p8 = pneg %p954_p7 }
 0x35e   : > { %1102 = dma.done.wait (%p955_p8), %s844_s17, 128  }
 0x35f   : > { %1104 = vsyncadd (%p955_p8), %s844_s17, 4294967168  ;;  %p17_p9 = scmp.ge.s32.totalorder %s1186_s30, 5   ;;  %s1528_s24 = smov %s1111_s25 }
 0x360   : > { %s1529_s25 = smov %s1115_s26  ;;  %s1530_s26 = smov %s1197_s10 }
 0x361   : > { %s1531_s27 = smov %s1186_s30  ;;  %19 = sbr.rel (!%p17_p9) target bundleno = 3 (0x3), region = 83 }
 0x366   :  { %850 = vsyncpa [#allocation3], 1 }
 0x367   :  { %852 = vsyncpa [#allocation3 + $0x1], 1 }

</bundles_post_ra>
